<compile_context>
chip_gen: v7x
topology: tpu7x:2x2x1
jax: 0.10.0
libtpu: 0.0.40
codegen_flags: <defaults>
</compile_context>

<pallas_src>
import jax
import jax.numpy as jnp
from jax import lax
from jax.experimental import pallas as pl
from jax.experimental.pallas import tpu as pltpu

MEAN = 0.5   # self.mean
STD = 2.0    # self.std


def deepar_kernel(x_ref, wih0_ref, b0_ref, whh0_ref, w1s_ref, b1_ref,
                  wfc_ref, bfc_ref, wml_ref, bml_ref, out_ref):
    T, B, _ = x_ref.shape
    G = whh0_ref.shape[1]                 # gate width = 4H
    H = G // 4
    f32, bf16 = jnp.float32, jnp.bfloat16

    # ---- Precompute layer-0 input contribution for all timesteps (one vectorized
    # op OUTSIDE the serial recurrence): xg[t] = ((x_t - MEAN)/STD) * W_ih0 + b0.
    xn = (x_ref[...] - MEAN) * (1.0 / STD)            # (T, B, 1)
    xg = xn * wih0_ref[...] + b0_ref[...]             # (T, B, 4H) f32

    # ---- Loop-invariant operands loaded / broadcast once.
    whh0 = whh0_ref[...]                              # (4H, 4H) bf16, rows >= H are 0
    w1s = w1s_ref[...]                                # (8H, 4H) bf16 stacked layer-1 W
    b1 = jnp.broadcast_to(b1_ref[...], (B, G))        # hoisted (B, 4H) bias

    def cell(gates, c):
        # Full-width gate math: sigmoid/tanh over all 4H lanes (EUP slot is free
        # filler), then XLU lane-rolls align f/g/o with the i lanes -> no 32-lane
        # sub-slice relayouts in the hot loop.  Only lanes [0, H) of the returned
        # h/c are meaningful; the remaining lanes are bounded junk that is killed
        # exactly by the zero-padded weight rows downstream.
        sg = jax.nn.sigmoid(gates)                    # holds i | f | . | o
        th = jnp.tanh(gates)                          # holds . | . | g | .
        f_al = pltpu.roll(sg, shift=3 * H, axis=1)    # f -> lanes [0, H)
        g_al = pltpu.roll(th, shift=2 * H, axis=1)    # g -> lanes [0, H)
        o_al = pltpu.roll(sg, shift=1 * H, axis=1)    # o -> lanes [0, H)
        c_new = f_al * c + sg * g_al                  # i already at lanes [0, H)
        h_new = o_al * jnp.tanh(c_new)
        return h_new, c_new

    zeros = jnp.zeros((B, G), f32)
    h0, c0, h1, c1 = zeros, zeros, zeros, zeros

    # ---- Fully unrolled recurrence (T is small and static): lets the scheduler
    # interleave MXU / EUP / XLU work from adjacent timesteps.
    for t in range(T):
        # layer 0: only the recurrent matmul remains on the serial path
        g0 = xg[t] + jnp.dot(h0.astype(bf16), whh0, preferred_element_type=f32)
        h0, c0 = cell(g0, c0)
        # layer 1: single fused matmul over [h0_new | h1_prev]
        cat = jnp.concatenate([h0, h1], axis=1).astype(bf16)          # (B, 8H)
        g1 = jnp.dot(cat, w1s, preferred_element_type=f32) + b1
        h1, c1 = cell(g1, c1)

    # ---- Head (epilogue): Linear(H,H)+ReLU, then fused mean/logvar Linear(H,2).
    hidden = jnp.maximum(
        jnp.dot(h1.astype(bf16), wfc_ref[...], preferred_element_type=f32)
        + bfc_ref[...], 0.0)                          # (B, 4H); lanes >= H are 0
    z = jnp.dot(hidden, wml_ref[...], preferred_element_type=f32) + bml_ref[...]
    col = lax.broadcasted_iota(jnp.int32, z.shape, 1)
    out_ref[...] = jnp.where(col == 0, z, jax.nn.softplus(z))   # [mean | softplus]


@jax.jit
def deepar_forward(x, params):
    """x: (B, condition_size) float32 -> (mean (B,1), logvar (B,1))."""
    B, T = x.shape
    Bp = ((B + 7) // 8) * 8                     # pad batch to the 8-sublane width
    x_p = jnp.zeros((Bp, T), jnp.float32).at[:B].set(x)
    x_k = x_p.T[:, :, None]                     # (T, Bp, 1) time-major (layout only)

    inputs = (x_k, params["wih0"], params["b0"], params["whh0"], params["w1s"],
              params["b1"], params["wfc"], params["bfc"], params["wml"], params["bml"])
    vspec = pl.BlockSpec(memory_space=pltpu.MemorySpace.VMEM)
    out = pl.pallas_call(
        deepar_kernel,
        out_shape=jax.ShapeDtypeStruct((Bp, 2), jnp.float32),
        in_specs=[vspec] * len(inputs),
        out_specs=vspec,
    )(*inputs)
    return out[:B, 0:1], out[:B, 1:2]


def init_raw_params(key, hidden_size):
    """PyTorch-convention parameters (nn.LSTM / nn.Linear layouts), distinct keys."""
    H = hidden_size
    ks = jax.random.split(key, 14)
    s = 0.1
    n = lambda k, shape: s * jax.random.normal(k, shape, jnp.float32)
    return {
        "w_ih_l0": n(ks[0], (4 * H, 1)), "w_hh_l0": n(ks[1], (4 * H, H)),
        "b_ih_l0": n(ks[2], (4 * H,)),   "b_hh_l0": n(ks[3], (4 * H,)),
        "w_ih_l1": n(ks[4], (4 * H, H)), "w_hh_l1": n(ks[5], (4 * H, H)),
        "b_ih_l1": n(ks[6], (4 * H,)),   "b_hh_l1": n(ks[7], (4 * H,)),
        "w_fc": n(ks[8], (H, H)),        "b_fc": n(ks[9], (H,)),
        "w_m": n(ks[10], (1, H)),        "b_m": n(ks[11], (1,)),
        "w_l": n(ks[12], (1, H)),        "b_l": n(ks[13], (1,)),
    }


def prep_params(p, hidden_size):
    """Re-layout PyTorch-convention params for the kernel:
       - matmul weights transposed to (in, out)
       - contraction dims zero-padded to 4H so full-width (junk-lane) states
         contribute exactly zero
       - layer-1 input/recurrent weights stacked into one (8H, 4H) matrix
       - mean/logvar heads stacked into one (4H, 2) matrix
       - recurrence / FC matmul weights cast to bf16 (f32 accumulate in-kernel)
    """
    H = hidden_size
    G = 4 * H
    f32, bf16 = jnp.float32, jnp.bfloat16

    def pad_rows(w, rows):
        return jnp.zeros((rows, w.shape[1]), f32).at[: w.shape[0]].set(w)

    whh0 = pad_rows(p["w_hh_l0"].T, G)                            # (4H, 4H)
    w1s = (jnp.zeros((2 * G, G), f32)
           .at[:H].set(p["w_ih_l1"].T)                            # rows [0, H):  W_ih1
           .at[G:G + H].set(p["w_hh_l1"].T))                      # rows [4H,5H): W_hh1
    wfc = jnp.zeros((G, G), f32).at[:H, :H].set(p["w_fc"].T)      # (4H, 4H)
    bfc = jnp.zeros((1, G), f32).at[0, :H].set(p["b_fc"])
    wml = (jnp.zeros((G, 2), f32)
           .at[:H, 0].set(p["w_m"][0])
           .at[:H, 1].set(p["w_l"][0]))                           # (4H, 2)
    bml = jnp.stack([p["b_m"][0], p["b_l"][0]])[None, :]          # (1, 2)

    return {
        "wih0": p["w_ih_l0"].T,                                   # (1, 4H) f32
        "b0": (p["b_ih_l0"] + p["b_hh_l0"])[None, :],             # (1, 4H) f32
        "whh0": whh0.astype(bf16),
        "w1s": w1s.astype(bf16),
        "b1": (p["b_ih_l1"] + p["b_hh_l1"])[None, :],             # (1, 4H) f32
        "wfc": wfc.astype(bf16), "bfc": bfc,
        "wml": wml, "bml": bml,
    }


def reference_forward(x, p):
    """Pure-JAX f32 reference of DeepARModel.forward (LSTM path, PyTorch layout)."""
    B, T = x.shape
    H = p["w_hh_l0"].shape[1]
    xn = ((x - MEAN) / STD).T[:, :, None]               # (T, B, 1)

    def cell(gates, c):
        i = jax.nn.sigmoid(gates[:, :H])
        f = jax.nn.sigmoid(gates[:, H:2 * H])
        g = jnp.tanh(gates[:, 2 * H:3 * H])
        o = jax.nn.sigmoid(gates[:, 3 * H:])
        c = f * c + i * g
        return o * jnp.tanh(c), c

    h0 = c0 = h1 = c1 = jnp.zeros((B, H), jnp.float32)
    for t in range(T):
        g0 = xn[t] @ p["w_ih_l0"].T + h0 @ p["w_hh_l0"].T + p["b_ih_l0"] + p["b_hh_l0"]
        h0, c0 = cell(g0, c0)
        g1 = h0 @ p["w_ih_l1"].T + h1 @ p["w_hh_l1"].T + p["b_ih_l1"] + p["b_hh_l1"]
        h1, c1 = cell(g1, c1)
    hidden = jnp.maximum(h1 @ p["w_fc"].T + p["b_fc"], 0.0)
    m = hidden @ p["w_m"].T + p["b_m"]
    lv = jax.nn.softplus(hidden @ p["w_l"].T + p["b_l"])
    return m, lv


if __name__ == "__main__":
    B = 4             # batch_size
    T = 8             # condition_size
    H = 32            # hidden_size

    key = jax.random.PRNGKey(0)
    k_x, k_p = jax.random.split(key)
    x = jax.random.normal(k_x, (B, T), jnp.float32)
    raw = init_raw_params(k_p, H)
    kernel_params = prep_params(raw, H)

    out_mean, out_logvar = deepar_forward(x, kernel_params)
    out_mean = jax.block_until_ready(out_mean)
    out_logvar = jax.block_until_ready(out_logvar)

    ref_mean, ref_logvar = reference_forward(x, raw)
    assert out_mean.shape == (B, 1) and out_logvar.shape == (B, 1)
    # bf16 matmul operands introduce small, bounded differences vs. the f32 reference.
    assert jnp.allclose(out_mean, ref_mean, rtol=5e-2, atol=2e-3)
    assert jnp.allclose(out_logvar, ref_logvar, rtol=5e-2, atol=2e-3)

    print("KERNEL_OK")
</pallas_src>

<mosaic_0001>
module attributes {stable_mosaic.version = 11 : i64} {
  func.func @deepar_kernel(%arg0: memref<8x8x1xf32, #tpu.memory_space<vmem>>, %arg1: memref<1x128xf32, #tpu.memory_space<vmem>>, %arg2: memref<1x128xf32, #tpu.memory_space<vmem>>, %arg3: memref<128x128xbf16, #tpu.memory_space<vmem>>, %arg4: memref<256x128xbf16, #tpu.memory_space<vmem>>, %arg5: memref<1x128xf32, #tpu.memory_space<vmem>>, %arg6: memref<128x128xbf16, #tpu.memory_space<vmem>>, %arg7: memref<1x128xf32, #tpu.memory_space<vmem>>, %arg8: memref<128x2xf32, #tpu.memory_space<vmem>>, %arg9: memref<1x2xf32, #tpu.memory_space<vmem>>, %arg10: memref<8x2xf32, #tpu.memory_space<vmem>>) attributes {dimension_semantics = [], scalar_prefetch = 0 : i64, scratch_operands = 0 : i64, tpu.core_type = #tpu.core_type<tc>} {
    %c0 = arith.constant 0 : index
    %c0_0 = arith.constant 0 : index
    %c0_1 = arith.constant 0 : index
    %0 = vector.load %arg0[%c0, %c0_0, %c0_1] : memref<8x8x1xf32, #tpu.memory_space<vmem>>, vector<8x8x1xf32>
    %cst = arith.constant 5.000000e-01 : f32
    %1 = vector.broadcast %cst : f32 to vector<8x8x1xf32>
    %2 = arith.subf %0, %1 : vector<8x8x1xf32>
    %cst_2 = arith.constant 5.000000e-01 : f32
    %3 = vector.broadcast %cst_2 : f32 to vector<8x8x1xf32>
    %4 = arith.mulf %2, %3 : vector<8x8x1xf32>
    %c0_3 = arith.constant 0 : index
    %c0_4 = arith.constant 0 : index
    %5 = vector.load %arg1[%c0_3, %c0_4] : memref<1x128xf32, #tpu.memory_space<vmem>>, vector<1x128xf32>
    %6 = vector.shape_cast %5 : vector<1x128xf32> to vector<1x1x128xf32>
    %7 = vector.broadcast %4 : vector<8x8x1xf32> to vector<8x8x128xf32>
    %8 = vector.broadcast %6 : vector<1x1x128xf32> to vector<8x8x128xf32>
    %9 = arith.mulf %7, %8 : vector<8x8x128xf32>
    %c0_5 = arith.constant 0 : index
    %c0_6 = arith.constant 0 : index
    %10 = vector.load %arg2[%c0_5, %c0_6] : memref<1x128xf32, #tpu.memory_space<vmem>>, vector<1x128xf32>
    %11 = vector.shape_cast %10 : vector<1x128xf32> to vector<1x1x128xf32>
    %12 = vector.broadcast %11 : vector<1x1x128xf32> to vector<8x8x128xf32>
    %13 = arith.addf %9, %12 : vector<8x8x128xf32>
    %c0_7 = arith.constant 0 : index
    %c0_8 = arith.constant 0 : index
    %14 = vector.load %arg3[%c0_7, %c0_8] : memref<128x128xbf16, #tpu.memory_space<vmem>>, vector<128x128xbf16>
    %c0_9 = arith.constant 0 : index
    %c0_10 = arith.constant 0 : index
    %15 = vector.load %arg4[%c0_9, %c0_10] : memref<256x128xbf16, #tpu.memory_space<vmem>>, vector<256x128xbf16>
    %c0_11 = arith.constant 0 : index
    %c0_12 = arith.constant 0 : index
    %16 = vector.load %arg5[%c0_11, %c0_12] : memref<1x128xf32, #tpu.memory_space<vmem>>, vector<1x128xf32>
    %17 = vector.shape_cast %16 : vector<1x128xf32> to vector<1x128xf32>
    %18 = vector.broadcast %17 : vector<1x128xf32> to vector<8x128xf32>
    %cst_13 = arith.constant 0.000000e+00 : f32
    %19 = vector.broadcast %cst_13 : f32 to vector<8x128xf32>
    %20 = vector.extract_strided_slice %13 {offsets = [0, 0, 0], sizes = [1, 8, 128], strides = [1, 1, 1]} : vector<8x8x128xf32> to vector<1x8x128xf32>
    %21 = vector.shape_cast %20 : vector<1x8x128xf32> to vector<8x128xf32>
    %22 = arith.truncf %19 : vector<8x128xf32> to vector<8x128xbf16>
    %cst_14 = arith.constant dense<0.000000e+00> : vector<8x128xf32>
    %23 = tpu.matmul %22, %14, %cst_14 {dimension_numbers = #tpu.dot_dimension_numbers<[1], [0], [0], [1], [0, 0, 1, 1], [], []>} : vector<8x128xbf16>, vector<128x128xbf16>, vector<8x128xf32> -> vector<8x128xf32>
    %24 = arith.addf %21, %23 : vector<8x128xf32>
    %25 = arith.negf %24 : vector<8x128xf32>
    %26 = math.exp %25 : vector<8x128xf32>
    %cst_15 = arith.constant 1.000000e+00 : f32
    %27 = vector.broadcast %cst_15 : f32 to vector<8x128xf32>
    %28 = arith.addf %27, %26 : vector<8x128xf32>
    %29 = arith.divf %27, %28 : vector<8x128xf32>
    %30 = math.tanh %24 : vector<8x128xf32>
    %c96_i32 = arith.constant 96 : i32
    %31 = tpu.dynamic_rotate %29 by %c96_i32 dim 1 : vector<8x128xf32>, i32 -> vector<8x128xf32>
    %c64_i32 = arith.constant 64 : i32
    %32 = tpu.dynamic_rotate %30 by %c64_i32 dim 1 : vector<8x128xf32>, i32 -> vector<8x128xf32>
    %c32_i32 = arith.constant 32 : i32
    %33 = tpu.dynamic_rotate %29 by %c32_i32 dim 1 : vector<8x128xf32>, i32 -> vector<8x128xf32>
    %34 = arith.mulf %31, %19 : vector<8x128xf32>
    %35 = arith.mulf %29, %32 : vector<8x128xf32>
    %36 = arith.addf %34, %35 : vector<8x128xf32>
    %37 = math.tanh %36 : vector<8x128xf32>
    %38 = arith.mulf %33, %37 : vector<8x128xf32>
    %39 = tpu.concatenate %38, %19 in 1 : vector<8x128xf32>, vector<8x128xf32> -> vector<8x256xf32>
    %40 = arith.truncf %39 : vector<8x256xf32> to vector<8x256xbf16>
    %cst_16 = arith.constant dense<0.000000e+00> : vector<8x128xf32>
    %41 = tpu.matmul %40, %15, %cst_16 {dimension_numbers = #tpu.dot_dimension_numbers<[1], [0], [0], [1], [0, 0, 1, 1], [], []>} : vector<8x256xbf16>, vector<256x128xbf16>, vector<8x128xf32> -> vector<8x128xf32>
    %42 = arith.addf %41, %18 : vector<8x128xf32>
    %43 = arith.negf %42 : vector<8x128xf32>
    %44 = math.exp %43 : vector<8x128xf32>
    %cst_17 = arith.constant 1.000000e+00 : f32
    %45 = vector.broadcast %cst_17 : f32 to vector<8x128xf32>
    %46 = arith.addf %45, %44 : vector<8x128xf32>
    %47 = arith.divf %45, %46 : vector<8x128xf32>
    %48 = math.tanh %42 : vector<8x128xf32>
    %c96_i32_18 = arith.constant 96 : i32
    %49 = tpu.dynamic_rotate %47 by %c96_i32_18 dim 1 : vector<8x128xf32>, i32 -> vector<8x128xf32>
    %c64_i32_19 = arith.constant 64 : i32
    %50 = tpu.dynamic_rotate %48 by %c64_i32_19 dim 1 : vector<8x128xf32>, i32 -> vector<8x128xf32>
    %c32_i32_20 = arith.constant 32 : i32
    %51 = tpu.dynamic_rotate %47 by %c32_i32_20 dim 1 : vector<8x128xf32>, i32 -> vector<8x128xf32>
    %52 = arith.mulf %49, %19 : vector<8x128xf32>
    %53 = arith.mulf %47, %50 : vector<8x128xf32>
    %54 = arith.addf %52, %53 : vector<8x128xf32>
    %55 = math.tanh %54 : vector<8x128xf32>
    %56 = arith.mulf %51, %55 : vector<8x128xf32>
    %57 = vector.extract_strided_slice %13 {offsets = [1, 0, 0], sizes = [1, 8, 128], strides = [1, 1, 1]} : vector<8x8x128xf32> to vector<1x8x128xf32>
    %58 = vector.shape_cast %57 : vector<1x8x128xf32> to vector<8x128xf32>
    %59 = arith.truncf %38 : vector<8x128xf32> to vector<8x128xbf16>
    %cst_21 = arith.constant dense<0.000000e+00> : vector<8x128xf32>
    %60 = tpu.matmul %59, %14, %cst_21 {dimension_numbers = #tpu.dot_dimension_numbers<[1], [0], [0], [1], [0, 0, 1, 1], [], []>} : vector<8x128xbf16>, vector<128x128xbf16>, vector<8x128xf32> -> vector<8x128xf32>
    %61 = arith.addf %58, %60 : vector<8x128xf32>
    %62 = arith.negf %61 : vector<8x128xf32>
    %63 = math.exp %62 : vector<8x128xf32>
    %cst_22 = arith.constant 1.000000e+00 : f32
    %64 = vector.broadcast %cst_22 : f32 to vector<8x128xf32>
    %65 = arith.addf %64, %63 : vector<8x128xf32>
    %66 = arith.divf %64, %65 : vector<8x128xf32>
    %67 = math.tanh %61 : vector<8x128xf32>
    %c96_i32_23 = arith.constant 96 : i32
    %68 = tpu.dynamic_rotate %66 by %c96_i32_23 dim 1 : vector<8x128xf32>, i32 -> vector<8x128xf32>
    %c64_i32_24 = arith.constant 64 : i32
    %69 = tpu.dynamic_rotate %67 by %c64_i32_24 dim 1 : vector<8x128xf32>, i32 -> vector<8x128xf32>
    %c32_i32_25 = arith.constant 32 : i32
    %70 = tpu.dynamic_rotate %66 by %c32_i32_25 dim 1 : vector<8x128xf32>, i32 -> vector<8x128xf32>
    %71 = arith.mulf %68, %36 : vector<8x128xf32>
    %72 = arith.mulf %66, %69 : vector<8x128xf32>
    %73 = arith.addf %71, %72 : vector<8x128xf32>
    %74 = math.tanh %73 : vector<8x128xf32>
    %75 = arith.mulf %70, %74 : vector<8x128xf32>
    %76 = tpu.concatenate %75, %56 in 1 : vector<8x128xf32>, vector<8x128xf32> -> vector<8x256xf32>
    %77 = arith.truncf %76 : vector<8x256xf32> to vector<8x256xbf16>
    %cst_26 = arith.constant dense<0.000000e+00> : vector<8x128xf32>
    %78 = tpu.matmul %77, %15, %cst_26 {dimension_numbers = #tpu.dot_dimension_numbers<[1], [0], [0], [1], [0, 0, 1, 1], [], []>} : vector<8x256xbf16>, vector<256x128xbf16>, vector<8x128xf32> -> vector<8x128xf32>
    %79 = arith.addf %78, %18 : vector<8x128xf32>
    %80 = arith.negf %79 : vector<8x128xf32>
    %81 = math.exp %80 : vector<8x128xf32>
    %cst_27 = arith.constant 1.000000e+00 : f32
    %82 = vector.broadcast %cst_27 : f32 to vector<8x128xf32>
    %83 = arith.addf %82, %81 : vector<8x128xf32>
    %84 = arith.divf %82, %83 : vector<8x128xf32>
    %85 = math.tanh %79 : vector<8x128xf32>
    %c96_i32_28 = arith.constant 96 : i32
    %86 = tpu.dynamic_rotate %84 by %c96_i32_28 dim 1 : vector<8x128xf32>, i32 -> vector<8x128xf32>
    %c64_i32_29 = arith.constant 64 : i32
    %87 = tpu.dynamic_rotate %85 by %c64_i32_29 dim 1 : vector<8x128xf32>, i32 -> vector<8x128xf32>
    %c32_i32_30 = arith.constant 32 : i32
    %88 = tpu.dynamic_rotate %84 by %c32_i32_30 dim 1 : vector<8x128xf32>, i32 -> vector<8x128xf32>
    %89 = arith.mulf %86, %54 : vector<8x128xf32>
    %90 = arith.mulf %84, %87 : vector<8x128xf32>
    %91 = arith.addf %89, %90 : vector<8x128xf32>
    %92 = math.tanh %91 : vector<8x128xf32>
    %93 = arith.mulf %88, %92 : vector<8x128xf32>
    %94 = vector.extract_strided_slice %13 {offsets = [2, 0, 0], sizes = [1, 8, 128], strides = [1, 1, 1]} : vector<8x8x128xf32> to vector<1x8x128xf32>
    %95 = vector.shape_cast %94 : vector<1x8x128xf32> to vector<8x128xf32>
    %96 = arith.truncf %75 : vector<8x128xf32> to vector<8x128xbf16>
    %cst_31 = arith.constant dense<0.000000e+00> : vector<8x128xf32>
    %97 = tpu.matmul %96, %14, %cst_31 {dimension_numbers = #tpu.dot_dimension_numbers<[1], [0], [0], [1], [0, 0, 1, 1], [], []>} : vector<8x128xbf16>, vector<128x128xbf16>, vector<8x128xf32> -> vector<8x128xf32>
    %98 = arith.addf %95, %97 : vector<8x128xf32>
    %99 = arith.negf %98 : vector<8x128xf32>
    %100 = math.exp %99 : vector<8x128xf32>
    %cst_32 = arith.constant 1.000000e+00 : f32
    %101 = vector.broadcast %cst_32 : f32 to vector<8x128xf32>
    %102 = arith.addf %101, %100 : vector<8x128xf32>
    %103 = arith.divf %101, %102 : vector<8x128xf32>
    %104 = math.tanh %98 : vector<8x128xf32>
    %c96_i32_33 = arith.constant 96 : i32
    %105 = tpu.dynamic_rotate %103 by %c96_i32_33 dim 1 : vector<8x128xf32>, i32 -> vector<8x128xf32>
    %c64_i32_34 = arith.constant 64 : i32
    %106 = tpu.dynamic_rotate %104 by %c64_i32_34 dim 1 : vector<8x128xf32>, i32 -> vector<8x128xf32>
    %c32_i32_35 = arith.constant 32 : i32
    %107 = tpu.dynamic_rotate %103 by %c32_i32_35 dim 1 : vector<8x128xf32>, i32 -> vector<8x128xf32>
    %108 = arith.mulf %105, %73 : vector<8x128xf32>
    %109 = arith.mulf %103, %106 : vector<8x128xf32>
    %110 = arith.addf %108, %109 : vector<8x128xf32>
    %111 = math.tanh %110 : vector<8x128xf32>
    %112 = arith.mulf %107, %111 : vector<8x128xf32>
    %113 = tpu.concatenate %112, %93 in 1 : vector<8x128xf32>, vector<8x128xf32> -> vector<8x256xf32>
    %114 = arith.truncf %113 : vector<8x256xf32> to vector<8x256xbf16>
    %cst_36 = arith.constant dense<0.000000e+00> : vector<8x128xf32>
    %115 = tpu.matmul %114, %15, %cst_36 {dimension_numbers = #tpu.dot_dimension_numbers<[1], [0], [0], [1], [0, 0, 1, 1], [], []>} : vector<8x256xbf16>, vector<256x128xbf16>, vector<8x128xf32> -> vector<8x128xf32>
    %116 = arith.addf %115, %18 : vector<8x128xf32>
    %117 = arith.negf %116 : vector<8x128xf32>
    %118 = math.exp %117 : vector<8x128xf32>
    %cst_37 = arith.constant 1.000000e+00 : f32
    %119 = vector.broadcast %cst_37 : f32 to vector<8x128xf32>
    %120 = arith.addf %119, %118 : vector<8x128xf32>
    %121 = arith.divf %119, %120 : vector<8x128xf32>
    %122 = math.tanh %116 : vector<8x128xf32>
    %c96_i32_38 = arith.constant 96 : i32
    %123 = tpu.dynamic_rotate %121 by %c96_i32_38 dim 1 : vector<8x128xf32>, i32 -> vector<8x128xf32>
    %c64_i32_39 = arith.constant 64 : i32
    %124 = tpu.dynamic_rotate %122 by %c64_i32_39 dim 1 : vector<8x128xf32>, i32 -> vector<8x128xf32>
    %c32_i32_40 = arith.constant 32 : i32
    %125 = tpu.dynamic_rotate %121 by %c32_i32_40 dim 1 : vector<8x128xf32>, i32 -> vector<8x128xf32>
    %126 = arith.mulf %123, %91 : vector<8x128xf32>
    %127 = arith.mulf %121, %124 : vector<8x128xf32>
    %128 = arith.addf %126, %127 : vector<8x128xf32>
    %129 = math.tanh %128 : vector<8x128xf32>
    %130 = arith.mulf %125, %129 : vector<8x128xf32>
    %131 = vector.extract_strided_slice %13 {offsets = [3, 0, 0], sizes = [1, 8, 128], strides = [1, 1, 1]} : vector<8x8x128xf32> to vector<1x8x128xf32>
    %132 = vector.shape_cast %131 : vector<1x8x128xf32> to vector<8x128xf32>
    %133 = arith.truncf %112 : vector<8x128xf32> to vector<8x128xbf16>
    %cst_41 = arith.constant dense<0.000000e+00> : vector<8x128xf32>
    %134 = tpu.matmul %133, %14, %cst_41 {dimension_numbers = #tpu.dot_dimension_numbers<[1], [0], [0], [1], [0, 0, 1, 1], [], []>} : vector<8x128xbf16>, vector<128x128xbf16>, vector<8x128xf32> -> vector<8x128xf32>
    %135 = arith.addf %132, %134 : vector<8x128xf32>
    %136 = arith.negf %135 : vector<8x128xf32>
    %137 = math.exp %136 : vector<8x128xf32>
    %cst_42 = arith.constant 1.000000e+00 : f32
    %138 = vector.broadcast %cst_42 : f32 to vector<8x128xf32>
    %139 = arith.addf %138, %137 : vector<8x128xf32>
    %140 = arith.divf %138, %139 : vector<8x128xf32>
    %141 = math.tanh %135 : vector<8x128xf32>
    %c96_i32_43 = arith.constant 96 : i32
    %142 = tpu.dynamic_rotate %140 by %c96_i32_43 dim 1 : vector<8x128xf32>, i32 -> vector<8x128xf32>
    %c64_i32_44 = arith.constant 64 : i32
    %143 = tpu.dynamic_rotate %141 by %c64_i32_44 dim 1 : vector<8x128xf32>, i32 -> vector<8x128xf32>
    %c32_i32_45 = arith.constant 32 : i32
    %144 = tpu.dynamic_rotate %140 by %c32_i32_45 dim 1 : vector<8x128xf32>, i32 -> vector<8x128xf32>
    %145 = arith.mulf %142, %110 : vector<8x128xf32>
    %146 = arith.mulf %140, %143 : vector<8x128xf32>
    %147 = arith.addf %145, %146 : vector<8x128xf32>
    %148 = math.tanh %147 : vector<8x128xf32>
    %149 = arith.mulf %144, %148 : vector<8x128xf32>
    %150 = tpu.concatenate %149, %130 in 1 : vector<8x128xf32>, vector<8x128xf32> -> vector<8x256xf32>
    %151 = arith.truncf %150 : vector<8x256xf32> to vector<8x256xbf16>
    %cst_46 = arith.constant dense<0.000000e+00> : vector<8x128xf32>
    %152 = tpu.matmul %151, %15, %cst_46 {dimension_numbers = #tpu.dot_dimension_numbers<[1], [0], [0], [1], [0, 0, 1, 1], [], []>} : vector<8x256xbf16>, vector<256x128xbf16>, vector<8x128xf32> -> vector<8x128xf32>
    %153 = arith.addf %152, %18 : vector<8x128xf32>
    %154 = arith.negf %153 : vector<8x128xf32>
    %155 = math.exp %154 : vector<8x128xf32>
    %cst_47 = arith.constant 1.000000e+00 : f32
    %156 = vector.broadcast %cst_47 : f32 to vector<8x128xf32>
    %157 = arith.addf %156, %155 : vector<8x128xf32>
    %158 = arith.divf %156, %157 : vector<8x128xf32>
    %159 = math.tanh %153 : vector<8x128xf32>
    %c96_i32_48 = arith.constant 96 : i32
    %160 = tpu.dynamic_rotate %158 by %c96_i32_48 dim 1 : vector<8x128xf32>, i32 -> vector<8x128xf32>
    %c64_i32_49 = arith.constant 64 : i32
    %161 = tpu.dynamic_rotate %159 by %c64_i32_49 dim 1 : vector<8x128xf32>, i32 -> vector<8x128xf32>
    %c32_i32_50 = arith.constant 32 : i32
    %162 = tpu.dynamic_rotate %158 by %c32_i32_50 dim 1 : vector<8x128xf32>, i32 -> vector<8x128xf32>
    %163 = arith.mulf %160, %128 : vector<8x128xf32>
    %164 = arith.mulf %158, %161 : vector<8x128xf32>
    %165 = arith.addf %163, %164 : vector<8x128xf32>
    %166 = math.tanh %165 : vector<8x128xf32>
    %167 = arith.mulf %162, %166 : vector<8x128xf32>
    %168 = vector.extract_strided_slice %13 {offsets = [4, 0, 0], sizes = [1, 8, 128], strides = [1, 1, 1]} : vector<8x8x128xf32> to vector<1x8x128xf32>
    %169 = vector.shape_cast %168 : vector<1x8x128xf32> to vector<8x128xf32>
    %170 = arith.truncf %149 : vector<8x128xf32> to vector<8x128xbf16>
    %cst_51 = arith.constant dense<0.000000e+00> : vector<8x128xf32>
    %171 = tpu.matmul %170, %14, %cst_51 {dimension_numbers = #tpu.dot_dimension_numbers<[1], [0], [0], [1], [0, 0, 1, 1], [], []>} : vector<8x128xbf16>, vector<128x128xbf16>, vector<8x128xf32> -> vector<8x128xf32>
    %172 = arith.addf %169, %171 : vector<8x128xf32>
    %173 = arith.negf %172 : vector<8x128xf32>
    %174 = math.exp %173 : vector<8x128xf32>
    %cst_52 = arith.constant 1.000000e+00 : f32
    %175 = vector.broadcast %cst_52 : f32 to vector<8x128xf32>
    %176 = arith.addf %175, %174 : vector<8x128xf32>
    %177 = arith.divf %175, %176 : vector<8x128xf32>
    %178 = math.tanh %172 : vector<8x128xf32>
    %c96_i32_53 = arith.constant 96 : i32
    %179 = tpu.dynamic_rotate %177 by %c96_i32_53 dim 1 : vector<8x128xf32>, i32 -> vector<8x128xf32>
    %c64_i32_54 = arith.constant 64 : i32
    %180 = tpu.dynamic_rotate %178 by %c64_i32_54 dim 1 : vector<8x128xf32>, i32 -> vector<8x128xf32>
    %c32_i32_55 = arith.constant 32 : i32
    %181 = tpu.dynamic_rotate %177 by %c32_i32_55 dim 1 : vector<8x128xf32>, i32 -> vector<8x128xf32>
    %182 = arith.mulf %179, %147 : vector<8x128xf32>
    %183 = arith.mulf %177, %180 : vector<8x128xf32>
    %184 = arith.addf %182, %183 : vector<8x128xf32>
    %185 = math.tanh %184 : vector<8x128xf32>
    %186 = arith.mulf %181, %185 : vector<8x128xf32>
    %187 = tpu.concatenate %186, %167 in 1 : vector<8x128xf32>, vector<8x128xf32> -> vector<8x256xf32>
    %188 = arith.truncf %187 : vector<8x256xf32> to vector<8x256xbf16>
    %cst_56 = arith.constant dense<0.000000e+00> : vector<8x128xf32>
    %189 = tpu.matmul %188, %15, %cst_56 {dimension_numbers = #tpu.dot_dimension_numbers<[1], [0], [0], [1], [0, 0, 1, 1], [], []>} : vector<8x256xbf16>, vector<256x128xbf16>, vector<8x128xf32> -> vector<8x128xf32>
    %190 = arith.addf %189, %18 : vector<8x128xf32>
    %191 = arith.negf %190 : vector<8x128xf32>
    %192 = math.exp %191 : vector<8x128xf32>
    %cst_57 = arith.constant 1.000000e+00 : f32
    %193 = vector.broadcast %cst_57 : f32 to vector<8x128xf32>
    %194 = arith.addf %193, %192 : vector<8x128xf32>
    %195 = arith.divf %193, %194 : vector<8x128xf32>
    %196 = math.tanh %190 : vector<8x128xf32>
    %c96_i32_58 = arith.constant 96 : i32
    %197 = tpu.dynamic_rotate %195 by %c96_i32_58 dim 1 : vector<8x128xf32>, i32 -> vector<8x128xf32>
    %c64_i32_59 = arith.constant 64 : i32
    %198 = tpu.dynamic_rotate %196 by %c64_i32_59 dim 1 : vector<8x128xf32>, i32 -> vector<8x128xf32>
    %c32_i32_60 = arith.constant 32 : i32
    %199 = tpu.dynamic_rotate %195 by %c32_i32_60 dim 1 : vector<8x128xf32>, i32 -> vector<8x128xf32>
    %200 = arith.mulf %197, %165 : vector<8x128xf32>
    %201 = arith.mulf %195, %198 : vector<8x128xf32>
    %202 = arith.addf %200, %201 : vector<8x128xf32>
    %203 = math.tanh %202 : vector<8x128xf32>
    %204 = arith.mulf %199, %203 : vector<8x128xf32>
    %205 = vector.extract_strided_slice %13 {offsets = [5, 0, 0], sizes = [1, 8, 128], strides = [1, 1, 1]} : vector<8x8x128xf32> to vector<1x8x128xf32>
    %206 = vector.shape_cast %205 : vector<1x8x128xf32> to vector<8x128xf32>
    %207 = arith.truncf %186 : vector<8x128xf32> to vector<8x128xbf16>
    %cst_61 = arith.constant dense<0.000000e+00> : vector<8x128xf32>
    %208 = tpu.matmul %207, %14, %cst_61 {dimension_numbers = #tpu.dot_dimension_numbers<[1], [0], [0], [1], [0, 0, 1, 1], [], []>} : vector<8x128xbf16>, vector<128x128xbf16>, vector<8x128xf32> -> vector<8x128xf32>
    %209 = arith.addf %206, %208 : vector<8x128xf32>
    %210 = arith.negf %209 : vector<8x128xf32>
    %211 = math.exp %210 : vector<8x128xf32>
    %cst_62 = arith.constant 1.000000e+00 : f32
    %212 = vector.broadcast %cst_62 : f32 to vector<8x128xf32>
    %213 = arith.addf %212, %211 : vector<8x128xf32>
    %214 = arith.divf %212, %213 : vector<8x128xf32>
    %215 = math.tanh %209 : vector<8x128xf32>
    %c96_i32_63 = arith.constant 96 : i32
    %216 = tpu.dynamic_rotate %214 by %c96_i32_63 dim 1 : vector<8x128xf32>, i32 -> vector<8x128xf32>
    %c64_i32_64 = arith.constant 64 : i32
    %217 = tpu.dynamic_rotate %215 by %c64_i32_64 dim 1 : vector<8x128xf32>, i32 -> vector<8x128xf32>
    %c32_i32_65 = arith.constant 32 : i32
    %218 = tpu.dynamic_rotate %214 by %c32_i32_65 dim 1 : vector<8x128xf32>, i32 -> vector<8x128xf32>
    %219 = arith.mulf %216, %184 : vector<8x128xf32>
    %220 = arith.mulf %214, %217 : vector<8x128xf32>
    %221 = arith.addf %219, %220 : vector<8x128xf32>
    %222 = math.tanh %221 : vector<8x128xf32>
    %223 = arith.mulf %218, %222 : vector<8x128xf32>
    %224 = tpu.concatenate %223, %204 in 1 : vector<8x128xf32>, vector<8x128xf32> -> vector<8x256xf32>
    %225 = arith.truncf %224 : vector<8x256xf32> to vector<8x256xbf16>
    %cst_66 = arith.constant dense<0.000000e+00> : vector<8x128xf32>
    %226 = tpu.matmul %225, %15, %cst_66 {dimension_numbers = #tpu.dot_dimension_numbers<[1], [0], [0], [1], [0, 0, 1, 1], [], []>} : vector<8x256xbf16>, vector<256x128xbf16>, vector<8x128xf32> -> vector<8x128xf32>
    %227 = arith.addf %226, %18 : vector<8x128xf32>
    %228 = arith.negf %227 : vector<8x128xf32>
    %229 = math.exp %228 : vector<8x128xf32>
    %cst_67 = arith.constant 1.000000e+00 : f32
    %230 = vector.broadcast %cst_67 : f32 to vector<8x128xf32>
    %231 = arith.addf %230, %229 : vector<8x128xf32>
    %232 = arith.divf %230, %231 : vector<8x128xf32>
    %233 = math.tanh %227 : vector<8x128xf32>
    %c96_i32_68 = arith.constant 96 : i32
    %234 = tpu.dynamic_rotate %232 by %c96_i32_68 dim 1 : vector<8x128xf32>, i32 -> vector<8x128xf32>
    %c64_i32_69 = arith.constant 64 : i32
    %235 = tpu.dynamic_rotate %233 by %c64_i32_69 dim 1 : vector<8x128xf32>, i32 -> vector<8x128xf32>
    %c32_i32_70 = arith.constant 32 : i32
    %236 = tpu.dynamic_rotate %232 by %c32_i32_70 dim 1 : vector<8x128xf32>, i32 -> vector<8x128xf32>
    %237 = arith.mulf %234, %202 : vector<8x128xf32>
    %238 = arith.mulf %232, %235 : vector<8x128xf32>
    %239 = arith.addf %237, %238 : vector<8x128xf32>
    %240 = math.tanh %239 : vector<8x128xf32>
    %241 = arith.mulf %236, %240 : vector<8x128xf32>
    %242 = vector.extract_strided_slice %13 {offsets = [6, 0, 0], sizes = [1, 8, 128], strides = [1, 1, 1]} : vector<8x8x128xf32> to vector<1x8x128xf32>
    %243 = vector.shape_cast %242 : vector<1x8x128xf32> to vector<8x128xf32>
    %244 = arith.truncf %223 : vector<8x128xf32> to vector<8x128xbf16>
    %cst_71 = arith.constant dense<0.000000e+00> : vector<8x128xf32>
    %245 = tpu.matmul %244, %14, %cst_71 {dimension_numbers = #tpu.dot_dimension_numbers<[1], [0], [0], [1], [0, 0, 1, 1], [], []>} : vector<8x128xbf16>, vector<128x128xbf16>, vector<8x128xf32> -> vector<8x128xf32>
    %246 = arith.addf %243, %245 : vector<8x128xf32>
    %247 = arith.negf %246 : vector<8x128xf32>
    %248 = math.exp %247 : vector<8x128xf32>
    %cst_72 = arith.constant 1.000000e+00 : f32
    %249 = vector.broadcast %cst_72 : f32 to vector<8x128xf32>
    %250 = arith.addf %249, %248 : vector<8x128xf32>
    %251 = arith.divf %249, %250 : vector<8x128xf32>
    %252 = math.tanh %246 : vector<8x128xf32>
    %c96_i32_73 = arith.constant 96 : i32
    %253 = tpu.dynamic_rotate %251 by %c96_i32_73 dim 1 : vector<8x128xf32>, i32 -> vector<8x128xf32>
    %c64_i32_74 = arith.constant 64 : i32
    %254 = tpu.dynamic_rotate %252 by %c64_i32_74 dim 1 : vector<8x128xf32>, i32 -> vector<8x128xf32>
    %c32_i32_75 = arith.constant 32 : i32
    %255 = tpu.dynamic_rotate %251 by %c32_i32_75 dim 1 : vector<8x128xf32>, i32 -> vector<8x128xf32>
    %256 = arith.mulf %253, %221 : vector<8x128xf32>
    %257 = arith.mulf %251, %254 : vector<8x128xf32>
    %258 = arith.addf %256, %257 : vector<8x128xf32>
    %259 = math.tanh %258 : vector<8x128xf32>
    %260 = arith.mulf %255, %259 : vector<8x128xf32>
    %261 = tpu.concatenate %260, %241 in 1 : vector<8x128xf32>, vector<8x128xf32> -> vector<8x256xf32>
    %262 = arith.truncf %261 : vector<8x256xf32> to vector<8x256xbf16>
    %cst_76 = arith.constant dense<0.000000e+00> : vector<8x128xf32>
    %263 = tpu.matmul %262, %15, %cst_76 {dimension_numbers = #tpu.dot_dimension_numbers<[1], [0], [0], [1], [0, 0, 1, 1], [], []>} : vector<8x256xbf16>, vector<256x128xbf16>, vector<8x128xf32> -> vector<8x128xf32>
    %264 = arith.addf %263, %18 : vector<8x128xf32>
    %265 = arith.negf %264 : vector<8x128xf32>
    %266 = math.exp %265 : vector<8x128xf32>
    %cst_77 = arith.constant 1.000000e+00 : f32
    %267 = vector.broadcast %cst_77 : f32 to vector<8x128xf32>
    %268 = arith.addf %267, %266 : vector<8x128xf32>
    %269 = arith.divf %267, %268 : vector<8x128xf32>
    %270 = math.tanh %264 : vector<8x128xf32>
    %c96_i32_78 = arith.constant 96 : i32
    %271 = tpu.dynamic_rotate %269 by %c96_i32_78 dim 1 : vector<8x128xf32>, i32 -> vector<8x128xf32>
    %c64_i32_79 = arith.constant 64 : i32
    %272 = tpu.dynamic_rotate %270 by %c64_i32_79 dim 1 : vector<8x128xf32>, i32 -> vector<8x128xf32>
    %c32_i32_80 = arith.constant 32 : i32
    %273 = tpu.dynamic_rotate %269 by %c32_i32_80 dim 1 : vector<8x128xf32>, i32 -> vector<8x128xf32>
    %274 = arith.mulf %271, %239 : vector<8x128xf32>
    %275 = arith.mulf %269, %272 : vector<8x128xf32>
    %276 = arith.addf %274, %275 : vector<8x128xf32>
    %277 = math.tanh %276 : vector<8x128xf32>
    %278 = arith.mulf %273, %277 : vector<8x128xf32>
    %279 = vector.extract_strided_slice %13 {offsets = [7, 0, 0], sizes = [1, 8, 128], strides = [1, 1, 1]} : vector<8x8x128xf32> to vector<1x8x128xf32>
    %280 = vector.shape_cast %279 : vector<1x8x128xf32> to vector<8x128xf32>
    %281 = arith.truncf %260 : vector<8x128xf32> to vector<8x128xbf16>
    %cst_81 = arith.constant dense<0.000000e+00> : vector<8x128xf32>
    %282 = tpu.matmul %281, %14, %cst_81 {dimension_numbers = #tpu.dot_dimension_numbers<[1], [0], [0], [1], [0, 0, 1, 1], [], []>} : vector<8x128xbf16>, vector<128x128xbf16>, vector<8x128xf32> -> vector<8x128xf32>
    %283 = arith.addf %280, %282 : vector<8x128xf32>
    %284 = arith.negf %283 : vector<8x128xf32>
    %285 = math.exp %284 : vector<8x128xf32>
    %cst_82 = arith.constant 1.000000e+00 : f32
    %286 = vector.broadcast %cst_82 : f32 to vector<8x128xf32>
    %287 = arith.addf %286, %285 : vector<8x128xf32>
    %288 = arith.divf %286, %287 : vector<8x128xf32>
    %289 = math.tanh %283 : vector<8x128xf32>
    %c96_i32_83 = arith.constant 96 : i32
    %290 = tpu.dynamic_rotate %288 by %c96_i32_83 dim 1 : vector<8x128xf32>, i32 -> vector<8x128xf32>
    %c64_i32_84 = arith.constant 64 : i32
    %291 = tpu.dynamic_rotate %289 by %c64_i32_84 dim 1 : vector<8x128xf32>, i32 -> vector<8x128xf32>
    %c32_i32_85 = arith.constant 32 : i32
    %292 = tpu.dynamic_rotate %288 by %c32_i32_85 dim 1 : vector<8x128xf32>, i32 -> vector<8x128xf32>
    %293 = arith.mulf %290, %258 : vector<8x128xf32>
    %294 = arith.mulf %288, %291 : vector<8x128xf32>
    %295 = arith.addf %293, %294 : vector<8x128xf32>
    %296 = math.tanh %295 : vector<8x128xf32>
    %297 = arith.mulf %292, %296 : vector<8x128xf32>
    %298 = tpu.concatenate %297, %278 in 1 : vector<8x128xf32>, vector<8x128xf32> -> vector<8x256xf32>
    %299 = arith.truncf %298 : vector<8x256xf32> to vector<8x256xbf16>
    %cst_86 = arith.constant dense<0.000000e+00> : vector<8x128xf32>
    %300 = tpu.matmul %299, %15, %cst_86 {dimension_numbers = #tpu.dot_dimension_numbers<[1], [0], [0], [1], [0, 0, 1, 1], [], []>} : vector<8x256xbf16>, vector<256x128xbf16>, vector<8x128xf32> -> vector<8x128xf32>
    %301 = arith.addf %300, %18 : vector<8x128xf32>
    %302 = arith.negf %301 : vector<8x128xf32>
    %303 = math.exp %302 : vector<8x128xf32>
    %cst_87 = arith.constant 1.000000e+00 : f32
    %304 = vector.broadcast %cst_87 : f32 to vector<8x128xf32>
    %305 = arith.addf %304, %303 : vector<8x128xf32>
    %306 = arith.divf %304, %305 : vector<8x128xf32>
    %307 = math.tanh %301 : vector<8x128xf32>
    %c96_i32_88 = arith.constant 96 : i32
    %308 = tpu.dynamic_rotate %306 by %c96_i32_88 dim 1 : vector<8x128xf32>, i32 -> vector<8x128xf32>
    %c64_i32_89 = arith.constant 64 : i32
    %309 = tpu.dynamic_rotate %307 by %c64_i32_89 dim 1 : vector<8x128xf32>, i32 -> vector<8x128xf32>
    %c32_i32_90 = arith.constant 32 : i32
    %310 = tpu.dynamic_rotate %306 by %c32_i32_90 dim 1 : vector<8x128xf32>, i32 -> vector<8x128xf32>
    %311 = arith.mulf %308, %276 : vector<8x128xf32>
    %312 = arith.mulf %306, %309 : vector<8x128xf32>
    %313 = arith.addf %311, %312 : vector<8x128xf32>
    %314 = math.tanh %313 : vector<8x128xf32>
    %315 = arith.mulf %310, %314 : vector<8x128xf32>
    %316 = arith.truncf %315 : vector<8x128xf32> to vector<8x128xbf16>
    %c0_91 = arith.constant 0 : index
    %c0_92 = arith.constant 0 : index
    %317 = vector.load %arg6[%c0_91, %c0_92] : memref<128x128xbf16, #tpu.memory_space<vmem>>, vector<128x128xbf16>
    %cst_93 = arith.constant dense<0.000000e+00> : vector<8x128xf32>
    %318 = tpu.matmul %316, %317, %cst_93 {dimension_numbers = #tpu.dot_dimension_numbers<[1], [0], [0], [1], [0, 0, 1, 1], [], []>} : vector<8x128xbf16>, vector<128x128xbf16>, vector<8x128xf32> -> vector<8x128xf32>
    %c0_94 = arith.constant 0 : index
    %c0_95 = arith.constant 0 : index
    %319 = vector.load %arg7[%c0_94, %c0_95] : memref<1x128xf32, #tpu.memory_space<vmem>>, vector<1x128xf32>
    %320 = vector.broadcast %319 : vector<1x128xf32> to vector<8x128xf32>
    %321 = arith.addf %318, %320 : vector<8x128xf32>
    %cst_96 = arith.constant 0.000000e+00 : f32
    %322 = vector.broadcast %cst_96 : f32 to vector<8x128xf32>
    %323 = arith.maximumf %321, %322 : vector<8x128xf32>
    %c0_97 = arith.constant 0 : index
    %c0_98 = arith.constant 0 : index
    %324 = vector.load %arg8[%c0_97, %c0_98] : memref<128x2xf32, #tpu.memory_space<vmem>>, vector<128x2xf32>
    %cst_99 = arith.constant dense<0.000000e+00> : vector<8x2xf32>
    %325 = tpu.matmul %323, %324, %cst_99 {dimension_numbers = #tpu.dot_dimension_numbers<[1], [0], [0], [1], [0, 0, 1, 1], [], []>} : vector<8x128xf32>, vector<128x2xf32>, vector<8x2xf32> -> vector<8x2xf32>
    %c0_100 = arith.constant 0 : index
    %c0_101 = arith.constant 0 : index
    %326 = vector.load %arg9[%c0_100, %c0_101] : memref<1x2xf32, #tpu.memory_space<vmem>>, vector<1x2xf32>
    %327 = vector.broadcast %326 : vector<1x2xf32> to vector<8x2xf32>
    %328 = arith.addf %325, %327 : vector<8x2xf32>
    %329 = tpu.iota {dimensions = array<i32: 1>} : vector<8x2xi32>
    %c0_i32 = arith.constant 0 : i32
    %330 = vector.broadcast %c0_i32 : i32 to vector<8x2xi32>
    %331 = arith.cmpi eq, %329, %330 : vector<8x2xi32>
    %cst_102 = arith.constant 0.000000e+00 : f32
    %332 = vector.broadcast %cst_102 : f32 to vector<8x2xf32>
    %333 = arith.maximumf %328, %332 : vector<8x2xf32>
    %334 = vector.broadcast %cst_102 : f32 to vector<8x2xf32>
    %335 = arith.subf %328, %334 : vector<8x2xf32>
    %336 = arith.cmpf one, %335, %335 : vector<8x2xf32>
    %337 = vector.broadcast %cst_102 : f32 to vector<8x2xf32>
    %338 = arith.addf %328, %337 : vector<8x2xf32>
    %339 = math.absf %335 : vector<8x2xf32>
    %cst_103 = arith.constant 0.000000e+00 : f32
    %340 = vector.broadcast %cst_103 : f32 to vector<8x2xf32>
    %341 = arith.subf %340, %339 : vector<8x2xf32>
    %342 = math.exp %341 : vector<8x2xf32>
    %343 = math.log1p %342 : vector<8x2xf32>
    %344 = arith.addf %333, %343 : vector<8x2xf32>
    %345 = arith.select %336, %338, %344 : vector<8x2xi1>, vector<8x2xf32>
    %346 = arith.select %331, %328, %345 : vector<8x2xi1>, vector<8x2xf32>
    %c0_104 = arith.constant 0 : index
    %c0_105 = arith.constant 0 : index
    %347 = vector.load %arg10[%c0_104, %c0_105] : memref<8x2xf32, #tpu.memory_space<vmem>>, vector<8x2xf32>
    tpu.vector_store %arg10[%c0_104, %c0_105], %346 {strides = array<i32>} : memref<8x2xf32, #tpu.memory_space<vmem>>, vector<8x2xf32>,
    return
  }
}

</mosaic_0001>

<bundles_post_ra>
// kernel: deepar_forward.1
= control target key start
LH: loop header
LB: loop body
LE: loop exit
PB: predicated region body
PF: predicated region fallthrough
CT: control target
= control target key end

     0   :  { %15 = vsyncpa [#allocation3], 0  ;;  %s2330_s13 = smov [#allocation2]   ;;  %s3170_s0 = inlined_call_operand.vmem [shape: f32[8,8,1], index: 0, kind: input, shape index: {}]   ;;  %s3171_s1 = inlined_call_operand.vmem [shape: f32[1,128], index: 1, kind: input, shape index: {}]   ;;  %s3172_s2 = inlined_call_operand.vmem [shape: f32[1,128], index: 2, kind: input, shape index: {}]   ;;  %s3173_s3 = inlined_call_operand.vmem [shape: bf16[128,128], index: 3, kind: input, shape index: {}]   ;;  %s3174_s4 = inlined_call_operand.vmem [shape: bf16[256,128], index: 4, kind: input, shape index: {}]   ;;  %s3175_s5 = inlined_call_operand.vmem [shape: f32[1,128], index: 5, kind: input, shape index: {}]   ;;  %s3176_s6 = inlined_call_operand.hbm [shape: bf16[128,128], index: 6, kind: input, shape index: {}]   ;;  %s3177_s7 = inlined_call_operand.vmem [shape: f32[1,128], index: 7, kind: input, shape index: {}]   ;;  %s3178_s8 = inlined_call_operand.vmem [shape: f32[128,2], index: 8, kind: input, shape index: {}]   ;;  %s3179_s9 = inlined_call_operand.vmem [shape: f32[1,2], index: 9, kind: input, shape index: {}]   ;;  %s3180_s10 = inlined_call_operand.vmem [shape: f32[8,2], index: 10, kind: output, shape index: {}]  }
   0x1   :  { %s33_s14 = sshll.u32 %s2330_s13, 4  ;;  %s2306_s17 = scalar_lea.hbm %s3176_s6, 1024  ;;  %s34_s14 = int_to_ptr.vmem [resolvable:$true] %s33_s14 }
   0x2   :  { %p2307_p0 = scmp.ne.s32.totalorder %s3176_s6, %s2306_s17  ;;  %p2310_p1 = scmp.lt.u32.totalorder %s2306_s17, %s3176_s6 }
   0x4   :  { %p2312_p2 = pnand %p2310_p1, %p2307_p0 }
   0x6   :  { %2315 = shalt.err (!%p2312_p2)
}
   0x7   :  { %s2316_s22 = scalar_lea.vmem %s34_s14, 1024  ;;  %p2321_p4 = scmp.lt.s32.totalorder %s34_s14, %s34_s14 }
   0x8   :  { %p2317_p3 = scmp.ne.s32.totalorder %s34_s14, %s2316_s22  ;;  %p2322_p5 = scmp.lt.s32.totalorder %s2316_s22, %s2316_s22 }
   0xa   :  { %p2323_p6 = por %p2322_p5, %p2321_p4 }
   0xc   :  { %p2324_p7 = pnand %p2323_p6, %p2317_p3 }
   0xe   :  { %2327 = shalt.err (!%p2324_p7)
}
   0xf   :  { %s2331_s23 = smov 64   ;;  %s2332_s24 = smov 4  }
  0x10   :  { %39 = dma.hbm_to_vmem [thread:$0]  %s3176_s6, 1024, %s34_s14, [#allocation3], %s2331_s23, %s2331_s23, %s2332_s24  }
  0x11   :  { %2328 = dma.done.wait [#allocation3], 1024  }
  0x12   :  { %2329 = vsyncadd [#allocation3], 4294966272  ;;  %v2333_v0 = vmov 0.0   ;;  %vm2334_vm0 = vmmov 0   ;;  %v2335_v1 = vmov 0   ;;  %v2414_v2 = vld [vmem:[%s3173_s3] sm:$0xff]  }
  0x13   :  { %1865 = vmatprep.subr.bf16.mxu0 %v2333_v0  ;;  %1881 = vmatprep.mubr.msk.bf16.mxu0 %vm2334_vm0, %v2333_v0  ;;  %v2420_v3 = vld [vmem:[%s3173_s3 + $0x8] sm:$0xff]   ;;  %v2427_v4 = vld [vmem:[%s3173_s3 + $0x10] sm:$0xff]   ;;  %v50_v5 = vld [vmem:[%s3170_s0] sm:$0xff]  ;;  %s2336_s22 = smov 32   ;;  %s2337_s24 = smov 96   ;;  %v2338_v47 = vmov 0.0|0.0  }
  0x14   :  { %2113 = vset.pattern.permute.xlu0 %v2335_v1  ;;  %2114 = vset.pattern.permute.xlu1 %v2335_v1  ;;  %v2436_v6 = vld [vmem:[%s3173_s3 + $0x18] sm:$0xff]   ;;  %v1530_v7 = vadd.f32 -0.5, %v50_v5  ;;  %v2443_v9 = vld [vmem:[%s3173_s3 + $0x20] sm:$0xff]   ;;  %v2450_v10 = vld [vmem:[%s3173_s3 + $0x28] sm:$0xff]   ;;  %vm1523_vm4 = vcmask 15360  }
  0x15   :  { %1866 = vmatpush3.bf16.msra.mxu0 %v2414_v2  ;;  %v2457_v11 = vld [vmem:[%s3173_s3 + $0x30] sm:$0xff]   ;;  %v2465_v12 = vld [vmem:[%s3173_s3 + $0x38] sm:$0xff]   ;;  %v2491_v13 = vld [vmem:[%s3171_s1] ss:$0 sm:$0xff]  ;;  %436 = vmatprep.mubr.bf16.mxu1 %v2338_v47 }
  0x16   :  { %1867 = vmatprep.subr.bf16.mxu0 %v2333_v0  ;;  %v66_v8 = vmul.f32 0.5, %v1530_v7  ;;  %v2497_v16 = vld [vmem:[%s3172_s2] ss:$0 sm:$0xff]  ;;  %v2513_v23 = vld [vmem:[%s3174_s4 + $0x48] sm:$0xff]   ;;  %v2526_v28 = vld [vmem:[%s3174_s4 + $0x50] sm:$0xff]  }
  0x17   :  { %v2503_v21 = vld [vmem:[%s3174_s4 + $0x40] sm:$0xff]   ;;  %v2520_v27 = vld [vmem:[%s3174_s4 + $0x8] sm:$0xff]   ;;  %v2532_v29 = vld [vmem:[%s3174_s4 + $0x10] sm:$0xff]  }
  0x18   :  { %77 = vperm.xlu0 %2113, %v66_v8   ;;  %v2508_v22 = vld [vmem:[%s3174_s4] sm:$0xff]   ;;  %1600 = vmatprep.subr.bf16.mxu1 %v2503_v21  ;;  %v2538_v30 = vld [vmem:[%s3174_s4 + $0x58] sm:$0xff]   ;;  %v2564_v37 = vld [vmem:[%s3174_s4 + $0x68] sm:$0xff]  }
  0x19   :  { %1868 = vmatpush3.bf16.msra.mxu0 %v2420_v3  ;;  %1601 = vmatpush3.bf16.msra.mxu1 %v2508_v22  ;;  %v2546_v32 = vld [vmem:[%s3174_s4 + $0x18] sm:$0xff]   ;;  %v2552_v35 = vld [vmem:[%s3174_s4 + $0x60] sm:$0xff]   ;;  %v2569_v38 = vld [vmem:[%s3174_s4 + $0x28] sm:$0xff]  }
  0x1a   :  { %1869 = vmatprep.subr.bf16.mxu0 %v2333_v0  ;;  %1602 = vmatprep.subr.bf16.mxu1 %v2513_v23  ;;  %v2557_v36 = vld [vmem:[%s3174_s4 + $0x20] sm:$0xff]   ;;  %v2574_v39 = vld [vmem:[%s3174_s4 + $0x70] sm:$0xff]   ;;  %v51_v40 = vld [vmem:[%s3170_s0 + $0x8] sm:$0xff] }
  0x1b   :  { %v2584_v41 = vld [vmem:[%s3174_s4 + $0x30] sm:$0xff]   ;;  %v1531_v42 = vadd.f32 -0.5, %v51_v40  ;;  %v2590_v43 = vld [vmem:[%s3174_s4 + $0x78] sm:$0xff]   ;;  %v2646_v63 = vld [vmem:[%s3175_s5] ss:$0 sm:$0xff] }
  0x1c   :  { %v2596_v45 = vld [vmem:[%s3174_s4 + $0x38] sm:$0xff]  }
  0x1d   :  { %1870 = vmatpush3.bf16.msra.mxu0 %v2427_v4  ;;  %1603 = vmatpush3.bf16.msra.mxu1 %v2520_v27  ;;  %v67_v46 = vmul.f32 0.5, %v1531_v42 }
  0x1e   :  { %1871 = vmatprep.subr.bf16.mxu0 %v2333_v0  ;;  %1604 = vmatprep.subr.bf16.mxu1 %v2526_v28 }
  0x21   :  { %1872 = vmatpush3.bf16.msra.mxu0 %v2436_v6  ;;  %1605 = vmatpush3.bf16.msra.mxu1 %v2532_v29 }
  0x22   :  { %1873 = vmatprep.subr.bf16.mxu0 %v2333_v0  ;;  %1606 = vmatprep.subr.bf16.mxu1 %v2538_v30 }
  0x25   :  { %1874 = vmatpush3.bf16.msra.mxu0 %v2443_v9  ;;  %1607 = vmatpush3.bf16.msra.mxu1 %v2546_v32 }
  0x26   :  { %1875 = vmatprep.subr.bf16.mxu0 %v2333_v0  ;;  %1608 = vmatprep.subr.bf16.mxu1 %v2552_v35 }
  0x29   :  { %1876 = vmatpush3.bf16.msra.mxu0 %v2450_v10  ;;  %1609 = vmatpush3.bf16.msra.mxu1 %v2557_v36 }
  0x2a   :  { %1877 = vmatprep.subr.bf16.mxu0 %v2333_v0  ;;  %1610 = vmatprep.subr.bf16.mxu1 %v2564_v37 }
  0x2d   :  { %1878 = vmatpush3.bf16.msra.mxu0 %v2457_v11  ;;  %1611 = vmatpush3.bf16.msra.mxu1 %v2569_v38 }
  0x2e   :  { %1879 = vmatprep.subr.bf16.mxu0 %v2333_v0  ;;  %1612 = vmatprep.subr.bf16.mxu1 %v2574_v39 }
  0x31   :  { %1880 = vmatpush3.bf16.msra.mxu0 %v2465_v12  ;;  %1613 = vmatpush3.bf16.msra.mxu1 %v2584_v41 }
  0x32   :  { %1885 = vmatprep.subr.bf16.mxu0 %v2333_v0  ;;  %1614 = vmatprep.subr.bf16.mxu1 %v2590_v43 }
  0x34   :  { %1882 = vmatmul.mubr.bf16.vlgmr.msra.gmra.mrb[0].mxu0 %v2335_v1 }
  0x35   :  { %1886 = vmatpush3.bf16.msra.mxu0 %v2414_v2  ;;  %1901 = vmatprep.mubr.msk.bf16.mxu0 %vm2334_vm0, %v2333_v0 }
  0x36   :  { %1887 = vmatprep.subr.bf16.mxu0 %v2333_v0  ;;  %1615 = vmatpush3.bf16.msra.mxu1 %v2596_v45 }
  0x37   :  { %1631 = vmatprep.subr.bf16.mxu1 %v2503_v21 }
  0x39   :  { %1888 = vmatpush3.bf16.msra.mxu0 %v2420_v3 }
  0x3a   :  { %1889 = vmatprep.subr.bf16.mxu0 %v2333_v0 }
  0x3d   :  { %1890 = vmatpush3.bf16.msra.mxu0 %v2427_v4 }
  0x3e   :  { %1891 = vmatprep.subr.bf16.mxu0 %v2333_v0 }
  0x41   :  { %1892 = vmatpush3.bf16.msra.mxu0 %v2436_v6 }
  0x42   :  { %1893 = vmatprep.subr.bf16.mxu0 %v2333_v0 }
  0x45   :  { %1894 = vmatpush3.bf16.msra.mxu0 %v2443_v9 }
  0x46   :  { %1895 = vmatprep.subr.bf16.mxu0 %v2333_v0 }
  0x49   :  { %1896 = vmatpush3.bf16.msra.mxu0 %v2450_v10 }
  0x4a   :  { %1897 = vmatprep.subr.bf16.mxu0 %v2333_v0 }
  0x4d   :  { %1898 = vmatpush3.bf16.msra.mxu0 %v2457_v11 }
  0x4e   :  { %1899 = vmatprep.subr.bf16.mxu0 %v2333_v0 }
  0x51   :  { %1900 = vmatpush3.bf16.msra.mxu0 %v2465_v12 }
  0x52   :  { %1905 = vmatprep.subr.bf16.mxu0 %v2333_v0 }
  0x97   :  { %v78_v14 = vpop.permute.xlu0 %77 }
  0x98   :  { %v121_v15 = vmul.f32 %v2491_v13, %v78_v14 }
  0x9a   :  { %v136_v17 = vadd.f32 %v2497_v16, %v121_v15 }
 0x107   :  { %v281_v18 = vpop.f32.mrb[0].mxu0 }
 0x108   :  { %v287_v19 = vadd.f32 %v281_v18, %v136_v17  ;;  %v1883_v20 = vpop.f32.mrb[1].mxu0 }
 0x109   :  { %v284_v24 = vpop.f32.mrb[2].mxu0 }
 0x10a   :  { %v1549_v25 = vmul.f32 -1.442695, %v287_v19  ;;  %v1884_v26 = vpop.f32.mrb[3].mxu0  ;;  %2147 = vtanh.f32 %v287_v19 }
 0x10c   :  { %2149 = vpow2.f32 %v1549_v25 }
 0x114   :  { %v2148_v31 = vpop.eup %2147 }
 0x115   :  { %297 = vrot.lane.b32.xlu1 %v2148_v31, %s2331_s23 }
 0x116   :  { %v2150_v33 = vpop.eup %2149 }
 0x117   :  { %v291_v34 = vadd.f32 1.0, %v2150_v33 }
 0x119   :  { %2151 = vrcp.f32 %v291_v34 }
 0x123   :  { %v2152_v44 = vpop.eup %2151 }
 0x124   :  { %299 = vrot.lane.b32.xlu1 %v2152_v44, %s2336_s22  ;;  %295 = vrot.lane.b32.xlu0 %v2152_v44, %s2337_s24 }
 0x128   :  { %82 = vperm.xlu0 %2113, %v67_v46  }
 0x187   :  { %v298_v48 = vpop.permute.xlu1 %297 }
 0x188   :  { %v302_v50 = vmul.f32 %v2152_v44, %v298_v48  ;;  %v52_v44 = vld [vmem:[%s3170_s0 + $0x10] sm:$0xff] }
 0x189   :  { %v1532_v46 = vadd.f32 -0.5, %v52_v44 }
 0x18b   :  { %v68_v48 = vmul.f32 0.5, %v1532_v46 }
 0x196   :  { %v296_v49 = vpop.permute.xlu0 %295  ;;  %v300_v54 = vpop.permute.xlu1 %299 }
 0x197   :  { %v301_v51 = vmul.f32 0.0, %v296_v49 }
 0x199   :  { %v2604_v52 = vadd.f32 %v302_v50, %v301_v51 }
 0x19b   :  { %2153 = vtanh.f32 %v2604_v52 }
 0x1a5   :  { %v2154_v53 = vpop.eup %2153 }
 0x1a6   :  { %v305_v55 = vmul.f32 %v2154_v53, %v300_v54 }
 0x1a7   :  { %v83_v57 = vpop.permute.xlu0 %82 }
 0x1a8   :  { %v306_v56 = vpack.c.bf16 %v305_v55, %v305_v55  ;;  %v122_v58 = vmul.f32 %v2491_v13, %v83_v57 }
 0x1aa   :  { %437 = vmatmul.mubr.bf16.vlgmr.msra.gmra.mrb[0].mxu1 %v306_v56  ;;  %1902 = vmatmul.mubr.bf16.vlgmr.msra.gmra.mrb[4].mxu0 %v306_v56  ;;  %v137_v59 = vadd.f32 %v2497_v16, %v122_v58 }
 0x1ab   :  { %1632 = vmatpush3.bf16.msra.mxu1 %v2508_v22  ;;  %1906 = vmatpush3.bf16.msra.mxu0 %v2414_v2 }
 0x1ac   :  { %1633 = vmatprep.subr.bf16.mxu1 %v2513_v23  ;;  %1907 = vmatprep.subr.bf16.mxu0 %v2333_v0 }
 0x1ad   :  { %1921 = vmatprep.mubr.msk.bf16.mxu0 %vm2334_vm0, %v2333_v0 }
 0x1af   :  { %1634 = vmatpush3.bf16.msra.mxu1 %v2520_v27  ;;  %1908 = vmatpush3.bf16.msra.mxu0 %v2420_v3 }
 0x1b0   :  { %1635 = vmatprep.subr.bf16.mxu1 %v2526_v28  ;;  %1909 = vmatprep.subr.bf16.mxu0 %v2333_v0 }
 0x1b3   :  { %1636 = vmatpush3.bf16.msra.mxu1 %v2532_v29  ;;  %1910 = vmatpush3.bf16.msra.mxu0 %v2427_v4 }
 0x1b4   :  { %1637 = vmatprep.subr.bf16.mxu1 %v2538_v30  ;;  %1911 = vmatprep.subr.bf16.mxu0 %v2333_v0 }
 0x1b7   :  { %1638 = vmatpush3.bf16.msra.mxu1 %v2546_v32  ;;  %1912 = vmatpush3.bf16.msra.mxu0 %v2436_v6 }
 0x1b8   :  { %1639 = vmatprep.subr.bf16.mxu1 %v2552_v35  ;;  %1913 = vmatprep.subr.bf16.mxu0 %v2333_v0 }
 0x1bb   :  { %1640 = vmatpush3.bf16.msra.mxu1 %v2557_v36  ;;  %1914 = vmatpush3.bf16.msra.mxu0 %v2443_v9 }
 0x1bc   :  { %1641 = vmatprep.subr.bf16.mxu1 %v2564_v37  ;;  %1915 = vmatprep.subr.bf16.mxu0 %v2333_v0 }
 0x1bf   :  { %1642 = vmatpush3.bf16.msra.mxu1 %v2569_v38  ;;  %1916 = vmatpush3.bf16.msra.mxu0 %v2450_v10 }
 0x1c0   :  { %1643 = vmatprep.subr.bf16.mxu1 %v2574_v39  ;;  %1917 = vmatprep.subr.bf16.mxu0 %v2333_v0 }
 0x1c3   :  { %1644 = vmatpush3.bf16.msra.mxu1 %v2584_v41  ;;  %1918 = vmatpush3.bf16.msra.mxu0 %v2457_v11 }
 0x1c4   :  { %1645 = vmatprep.subr.bf16.mxu1 %v2590_v43  ;;  %1919 = vmatprep.subr.bf16.mxu0 %v2333_v0 }
 0x1c7   :  { %1646 = vmatpush3.bf16.msra.mxu1 %v2596_v45  ;;  %1920 = vmatpush3.bf16.msra.mxu0 %v2465_v12 }
 0x1c8   :  { %1662 = vmatprep.subr.bf16.mxu1 %v2503_v21  ;;  %1925 = vmatprep.subr.bf16.mxu0 %v2333_v0 }
 0x27d   :  { %v1616_v60 = vpop.f32.mrb[0].mxu1  ;;  %v496_v61 = vpop.f32.mrb[4].mxu0 }
 0x27e   :  { %v502_v62 = vadd.f32 %v496_v61, %v137_v59  ;;  %v1617_v1 = vpop.f32.mrb[1].mxu1  ;;  %v1903_v5 = vpop.f32.mrb[5].mxu0 }
 0x27f   :  { %v1618_v7 = vadd.f32 %v1617_v1, %v1616_v60  ;;  %v1619_v8 = vpop.f32.mrb[2].mxu1  ;;  %v499_v14 = vpop.f32.mrb[6].mxu0 }
 0x280   :  { %v1567_v15 = vmul.f32 -1.442695, %v502_v62  ;;  %v1620_v17 = vpop.f32.mrb[3].mxu1  ;;  %v1904_v18 = vpop.f32.mrb[7].mxu0 }
 0x281   :  { %v439_v19 = vadd.f32 %v1618_v7, %v2646_v63 }
 0x282   :  { %2155 = vpow2.f32 %v1567_v15 }
 0x283   :  { %v1566_v20 = vmul.f32 -1.442695, %v439_v19  ;;  %2157 = vtanh.f32 %v439_v19 }
 0x285   :  { %2159 = vpow2.f32 %v1566_v20 }
 0x286   :  { %2161 = vtanh.f32 %v502_v62 }
 0x28c   :  { %v2156_v24 = vpop.eup %2155 }
 0x28d   :  { %v2158_v25 = vpop.eup %2157  ;;  %v506_v26 = vadd.f32 1.0, %v2156_v24 }
 0x28e   :  { %453 = vrot.lane.b32.xlu0 %v2158_v25, %s2331_s23 }
 0x28f   :  { %v2160_v31 = vpop.eup %2159  ;;  %2163 = vrcp.f32 %v506_v26 }
 0x290   :  { %v447_v33 = vadd.f32 1.0, %v2160_v31  ;;  %v2162_v34 = vpop.eup %2161 }
 0x292   :  { %2165 = vrcp.f32 %v447_v33  ;;  %512 = vrot.lane.b32.xlu0 %v2162_v34, %s2331_s23 }
 0x299   :  { %v2164_v40 = vpop.eup %2163 }
 0x29a   :  { %514 = vrot.lane.b32.xlu0 %v2164_v40, %s2336_s22 }
 0x29c   :  { %v2166_v42 = vpop.eup %2165 }
 0x29d   :  { %451 = vrot.lane.b32.xlu1 %v2166_v42, %s2337_s24 }
 0x2a1   :  { %510 = vrot.lane.b32.xlu1 %v2164_v40, %s2337_s24 }
 0x2a5   :  { %455 = vrot.lane.b32.xlu1 %v2166_v42, %s2336_s22 }
 0x2a9   :  { %87 = vperm.xlu1 %2114, %v68_v48  }
 0x300   :  { %v454_v49 = vpop.permute.xlu0 %453 }
 0x301   :  { %v458_v51 = vmul.f32 %v2166_v42, %v454_v49 }
 0x304   :  { %v513_v54 = vpop.permute.xlu0 %512 }
 0x305   :  { %v517_v57 = vmul.f32 %v2164_v40, %v513_v54 }
 0x30c   :  { %v515_v7 = vpop.permute.xlu0 %514 }
 0x30f   :  { %v452_v50 = vpop.permute.xlu1 %451 }
 0x310   :  { %v457_v53 = vmul.f32 0.0, %v452_v50 }
 0x312   :  { %v2658_v55 = vadd.f32 %v458_v51, %v457_v53 }
 0x313   :  { %v511_v56 = vpop.permute.xlu1 %510 }
 0x314   :  { %2167 = vtanh.f32 %v2658_v55  ;;  %v516_v58 = vmul.f32 %v511_v56, %v2604_v52 }
 0x316   :  { %v2662_v59 = vadd.f32 %v517_v57, %v516_v58  ;;  %v53_v58 = vld [vmem:[%s3170_s0 + $0x18] sm:$0xff] }
 0x317   :  { %v456_v61 = vpop.permute.xlu1 %455 }
 0x318   :  { %2169 = vtanh.f32 %v2662_v59 }
 0x31e   :  { %v2168_v60 = vpop.eup %2167 }
 0x31f   :  { %v461_v62 = vmul.f32 %v2168_v60, %v456_v61  ;;  %v1533_v60 = vadd.f32 -0.5, %v53_v58 }
 0x321   :  { %v522_v1 = vpack.c.bf16 %v461_v62, %v461_v62  ;;  %v69_v61 = vmul.f32 0.5, %v1533_v60 }
 0x322   :  { %v2170_v5 = vpop.eup %2169 }
 0x323   :  { %555 = vmatprep.mubr.bf16.mxu1 %v522_v1  ;;  %v520_v8 = vmul.f32 %v2170_v5, %v515_v7 }
 0x325   :  { %v521_v14 = vpack.c.bf16 %v520_v8, %v520_v8 }
 0x327   :  { %556 = vmatmul.mubr.bf16.vlgmr.msra.gmra.mrb[4].mxu1 %v521_v14  ;;  %1922 = vmatmul.mubr.bf16.vlgmr.msra.gmra.mrb[8].mxu0 %v521_v14 }
 0x328   :  { %1663 = vmatpush3.bf16.msra.mxu1 %v2508_v22  ;;  %1926 = vmatpush3.bf16.msra.mxu0 %v2414_v2  ;;  %v88_v52 = vpop.permute.xlu1 %87 }
 0x329   :  { %1664 = vmatprep.subr.bf16.mxu1 %v2513_v23  ;;  %1927 = vmatprep.subr.bf16.mxu0 %v2333_v0  ;;  %v123_v15 = vmul.f32 %v2491_v13, %v88_v52 }
 0x32a   :  { %1941 = vmatprep.mubr.msk.bf16.mxu0 %vm2334_vm0, %v2333_v0 }
 0x32b   :  { %v138_v17 = vadd.f32 %v2497_v16, %v123_v15 }
 0x32c   :  { %1665 = vmatpush3.bf16.msra.mxu1 %v2520_v27  ;;  %1928 = vmatpush3.bf16.msra.mxu0 %v2420_v3 }
 0x32d   :  { %1666 = vmatprep.subr.bf16.mxu1 %v2526_v28  ;;  %1929 = vmatprep.subr.bf16.mxu0 %v2333_v0 }
 0x330   :  { %1667 = vmatpush3.bf16.msra.mxu1 %v2532_v29  ;;  %1930 = vmatpush3.bf16.msra.mxu0 %v2427_v4 }
 0x331   :  { %1668 = vmatprep.subr.bf16.mxu1 %v2538_v30  ;;  %1931 = vmatprep.subr.bf16.mxu0 %v2333_v0 }
 0x334   :  { %1669 = vmatpush3.bf16.msra.mxu1 %v2546_v32  ;;  %1932 = vmatpush3.bf16.msra.mxu0 %v2436_v6 }
 0x335   :  { %1670 = vmatprep.subr.bf16.mxu1 %v2552_v35  ;;  %1933 = vmatprep.subr.bf16.mxu0 %v2333_v0 }
 0x338   :  { %1671 = vmatpush3.bf16.msra.mxu1 %v2557_v36  ;;  %1934 = vmatpush3.bf16.msra.mxu0 %v2443_v9 }
 0x339   :  { %1672 = vmatprep.subr.bf16.mxu1 %v2564_v37  ;;  %1935 = vmatprep.subr.bf16.mxu0 %v2333_v0 }
 0x33c   :  { %1673 = vmatpush3.bf16.msra.mxu1 %v2569_v38  ;;  %1936 = vmatpush3.bf16.msra.mxu0 %v2450_v10 }
 0x33d   :  { %1674 = vmatprep.subr.bf16.mxu1 %v2574_v39  ;;  %1937 = vmatprep.subr.bf16.mxu0 %v2333_v0 }
 0x340   :  { %1675 = vmatpush3.bf16.msra.mxu1 %v2584_v41  ;;  %1938 = vmatpush3.bf16.msra.mxu0 %v2457_v11 }
 0x341   :  { %1676 = vmatprep.subr.bf16.mxu1 %v2590_v43  ;;  %1939 = vmatprep.subr.bf16.mxu0 %v2333_v0 }
 0x344   :  { %1677 = vmatpush3.bf16.msra.mxu1 %v2596_v45  ;;  %1940 = vmatpush3.bf16.msra.mxu0 %v2465_v12 }
 0x345   :  { %1693 = vmatprep.subr.bf16.mxu1 %v2503_v21  ;;  %1945 = vmatprep.subr.bf16.mxu0 %v2333_v0 }
 0x3fa   :  { %v1647_v18 = vpop.f32.mrb[4].mxu1  ;;  %v615_v19 = vpop.f32.mrb[8].mxu0 }
 0x3fb   :  { %v621_v20 = vadd.f32 %v615_v19, %v138_v17  ;;  %v1648_v24 = vpop.f32.mrb[5].mxu1  ;;  %v1923_v25 = vpop.f32.mrb[9].mxu0 }
 0x3fc   :  { %v1649_v26 = vadd.f32 %v1648_v24, %v1647_v18  ;;  %v1650_v31 = vpop.f32.mrb[6].mxu1  ;;  %v618_v33 = vpop.f32.mrb[10].mxu0 }
 0x3fd   :  { %v1569_v34 = vmul.f32 -1.442695, %v621_v20  ;;  %v1651_v40 = vpop.f32.mrb[7].mxu1  ;;  %v1924_v42 = vpop.f32.mrb[11].mxu0 }
 0x3fe   :  { %v558_v44 = vadd.f32 %v1649_v26, %v2646_v63 }
 0x3ff   :  { %2171 = vpow2.f32 %v1569_v34 }
 0x400   :  { %v1568_v46 = vmul.f32 -1.442695, %v558_v44  ;;  %2173 = vtanh.f32 %v558_v44 }
 0x402   :  { %2175 = vpow2.f32 %v1568_v46 }
 0x403   :  { %2177 = vtanh.f32 %v621_v20 }
 0x409   :  { %v2172_v48 = vpop.eup %2171 }
 0x40a   :  { %v2174_v49 = vpop.eup %2173  ;;  %v625_v50 = vadd.f32 1.0, %v2172_v48 }
 0x40b   :  { %572 = vrot.lane.b32.xlu1 %v2174_v49, %s2331_s23 }
 0x40c   :  { %v2176_v51 = vpop.eup %2175  ;;  %2179 = vrcp.f32 %v625_v50 }
 0x40d   :  { %v566_v53 = vadd.f32 1.0, %v2176_v51  ;;  %v2178_v54 = vpop.eup %2177 }
 0x40f   :  { %2181 = vrcp.f32 %v566_v53  ;;  %631 = vrot.lane.b32.xlu1 %v2178_v54, %s2331_s23 }
 0x416   :  { %v2180_v56 = vpop.eup %2179 }
 0x417   :  { %633 = vrot.lane.b32.xlu1 %v2180_v56, %s2336_s22 }
 0x419   :  { %v2182_v57 = vpop.eup %2181 }
 0x41a   :  { %570 = vrot.lane.b32.xlu0 %v2182_v57, %s2337_s24 }
 0x41e   :  { %629 = vrot.lane.b32.xlu0 %v2180_v56, %s2337_s24 }
 0x422   :  { %574 = vrot.lane.b32.xlu0 %v2182_v57, %s2336_s22 }
 0x426   :  { %92 = vperm.xlu0 %2113, %v69_v61  }
 0x47d   :  { %v573_v62 = vpop.permute.xlu1 %572 }
 0x47e   :  { %v577_v5 = vmul.f32 %v2182_v57, %v573_v62 }
 0x481   :  { %v632_v8 = vpop.permute.xlu1 %631 }
 0x482   :  { %v636_v15 = vmul.f32 %v2180_v56, %v632_v8 }
 0x489   :  { %v634_v31 = vpop.permute.xlu1 %633 }
 0x48c   :  { %v571_v1 = vpop.permute.xlu0 %570 }
 0x48d   :  { %v576_v7 = vmul.f32 %v571_v1, %v2658_v55 }
 0x48f   :  { %v2712_v14 = vadd.f32 %v577_v5, %v576_v7 }
 0x490   :  { %v630_v52 = vpop.permute.xlu0 %629 }
 0x491   :  { %2183 = vtanh.f32 %v2712_v14  ;;  %v635_v17 = vmul.f32 %v630_v52, %v2662_v59 }
 0x493   :  { %v2716_v18 = vadd.f32 %v636_v15, %v635_v17  ;;  %v54_v17 = vld [vmem:[%s3170_s0 + $0x20] sm:$0xff] }
 0x494   :  { %v575_v20 = vpop.permute.xlu0 %574 }
 0x495   :  { %2185 = vtanh.f32 %v2716_v18 }
 0x49b   :  { %v2184_v19 = vpop.eup %2183 }
 0x49c   :  { %v580_v24 = vmul.f32 %v2184_v19, %v575_v20  ;;  %v1534_v19 = vadd.f32 -0.5, %v54_v17 }
 0x49e   :  { %v641_v25 = vpack.c.bf16 %v580_v24, %v580_v24  ;;  %v70_v20 = vmul.f32 0.5, %v1534_v19 }
 0x49f   :  { %v2186_v26 = vpop.eup %2185 }
 0x4a0   :  { %674 = vmatprep.mubr.bf16.mxu1 %v641_v25  ;;  %v639_v55 = vmul.f32 %v2186_v26, %v634_v31 }
 0x4a2   :  { %v640_v33 = vpack.c.bf16 %v639_v55, %v639_v55 }
 0x4a4   :  { %675 = vmatmul.mubr.bf16.vlgmr.msra.gmra.mrb[8].mxu1 %v640_v33  ;;  %1942 = vmatmul.mubr.bf16.vlgmr.msra.gmra.mrb[12].mxu0 %v640_v33 }
 0x4a5   :  { %1694 = vmatpush3.bf16.msra.mxu1 %v2508_v22  ;;  %1946 = vmatpush3.bf16.msra.mxu0 %v2414_v2  ;;  %v93_v59 = vpop.permute.xlu0 %92 }
 0x4a6   :  { %1695 = vmatprep.subr.bf16.mxu1 %v2513_v23  ;;  %1947 = vmatprep.subr.bf16.mxu0 %v2333_v0  ;;  %v124_v34 = vmul.f32 %v2491_v13, %v93_v59 }
 0x4a7   :  { %1961 = vmatprep.mubr.msk.bf16.mxu0 %vm2334_vm0, %v2333_v0 }
 0x4a8   :  { %v139_v40 = vadd.f32 %v2497_v16, %v124_v34 }
 0x4a9   :  { %1696 = vmatpush3.bf16.msra.mxu1 %v2520_v27  ;;  %1948 = vmatpush3.bf16.msra.mxu0 %v2420_v3 }
 0x4aa   :  { %1697 = vmatprep.subr.bf16.mxu1 %v2526_v28  ;;  %1949 = vmatprep.subr.bf16.mxu0 %v2333_v0 }
 0x4ad   :  { %1698 = vmatpush3.bf16.msra.mxu1 %v2532_v29  ;;  %1950 = vmatpush3.bf16.msra.mxu0 %v2427_v4 }
 0x4ae   :  { %1699 = vmatprep.subr.bf16.mxu1 %v2538_v30  ;;  %1951 = vmatprep.subr.bf16.mxu0 %v2333_v0 }
 0x4b1   :  { %1700 = vmatpush3.bf16.msra.mxu1 %v2546_v32  ;;  %1952 = vmatpush3.bf16.msra.mxu0 %v2436_v6 }
 0x4b2   :  { %1701 = vmatprep.subr.bf16.mxu1 %v2552_v35  ;;  %1953 = vmatprep.subr.bf16.mxu0 %v2333_v0 }
 0x4b5   :  { %1702 = vmatpush3.bf16.msra.mxu1 %v2557_v36  ;;  %1954 = vmatpush3.bf16.msra.mxu0 %v2443_v9 }
 0x4b6   :  { %1703 = vmatprep.subr.bf16.mxu1 %v2564_v37  ;;  %1955 = vmatprep.subr.bf16.mxu0 %v2333_v0 }
 0x4b9   :  { %1704 = vmatpush3.bf16.msra.mxu1 %v2569_v38  ;;  %1956 = vmatpush3.bf16.msra.mxu0 %v2450_v10 }
 0x4ba   :  { %1705 = vmatprep.subr.bf16.mxu1 %v2574_v39  ;;  %1957 = vmatprep.subr.bf16.mxu0 %v2333_v0 }
 0x4bd   :  { %1706 = vmatpush3.bf16.msra.mxu1 %v2584_v41  ;;  %1958 = vmatpush3.bf16.msra.mxu0 %v2457_v11 }
 0x4be   :  { %1707 = vmatprep.subr.bf16.mxu1 %v2590_v43  ;;  %1959 = vmatprep.subr.bf16.mxu0 %v2333_v0 }
 0x4c1   :  { %1708 = vmatpush3.bf16.msra.mxu1 %v2596_v45  ;;  %1960 = vmatpush3.bf16.msra.mxu0 %v2465_v12 }
 0x4c2   :  { %1724 = vmatprep.subr.bf16.mxu1 %v2503_v21  ;;  %1965 = vmatprep.subr.bf16.mxu0 %v2333_v0 }
 0x577   :  { %v1678_v42 = vpop.f32.mrb[8].mxu1  ;;  %v734_v44 = vpop.f32.mrb[12].mxu0 }
 0x578   :  { %v740_v46 = vadd.f32 %v734_v44, %v139_v40  ;;  %v1679_v48 = vpop.f32.mrb[9].mxu1  ;;  %v1943_v49 = vpop.f32.mrb[13].mxu0 }
 0x579   :  { %v1680_v50 = vadd.f32 %v1679_v48, %v1678_v42  ;;  %v1681_v51 = vpop.f32.mrb[10].mxu1  ;;  %v737_v53 = vpop.f32.mrb[14].mxu0 }
 0x57a   :  { %v1571_v54 = vmul.f32 -1.442695, %v740_v46  ;;  %v1682_v56 = vpop.f32.mrb[11].mxu1  ;;  %v1944_v57 = vpop.f32.mrb[15].mxu0 }
 0x57b   :  { %v677_v58 = vadd.f32 %v1680_v50, %v2646_v63 }
 0x57c   :  { %2187 = vpow2.f32 %v1571_v54 }
 0x57d   :  { %v1570_v60 = vmul.f32 -1.442695, %v677_v58  ;;  %2189 = vtanh.f32 %v677_v58 }
 0x57f   :  { %2191 = vpow2.f32 %v1570_v60 }
 0x580   :  { %2193 = vtanh.f32 %v740_v46 }
 0x586   :  { %v2188_v61 = vpop.eup %2187 }
 0x587   :  { %v2190_v62 = vpop.eup %2189  ;;  %v744_v1 = vadd.f32 1.0, %v2188_v61 }
 0x588   :  { %691 = vrot.lane.b32.xlu0 %v2190_v62, %s2331_s23 }
 0x589   :  { %v2192_v5 = vpop.eup %2191  ;;  %2195 = vrcp.f32 %v744_v1 }
 0x58a   :  { %v685_v7 = vadd.f32 1.0, %v2192_v5  ;;  %v2194_v8 = vpop.eup %2193 }
 0x58c   :  { %2197 = vrcp.f32 %v685_v7  ;;  %750 = vrot.lane.b32.xlu0 %v2194_v8, %s2331_s23 }
 0x593   :  { %v2196_v52 = vpop.eup %2195 }
 0x594   :  { %752 = vrot.lane.b32.xlu0 %v2196_v52, %s2336_s22 }
 0x596   :  { %v2198_v15 = vpop.eup %2197 }
 0x597   :  { %689 = vrot.lane.b32.xlu1 %v2198_v15, %s2337_s24 }
 0x59b   :  { %748 = vrot.lane.b32.xlu1 %v2196_v52, %s2337_s24 }
 0x59f   :  { %693 = vrot.lane.b32.xlu1 %v2198_v15, %s2336_s22 }
 0x5a3   :  { %97 = vperm.xlu1 %2114, %v70_v20  }
 0x5fa   :  { %v692_v24 = vpop.permute.xlu0 %691 }
 0x5fb   :  { %v696_v26 = vmul.f32 %v2198_v15, %v692_v24  ;;  %v55_v24 = vld [vmem:[%s3170_s0 + $0x28] sm:$0xff] }
 0x5fe   :  { %v751_v55 = vpop.permute.xlu0 %750 }
 0x5ff   :  { %v755_v34 = vmul.f32 %v2196_v52, %v751_v55 }
 0x606   :  { %v753_v51 = vpop.permute.xlu0 %752 }
 0x609   :  { %v690_v25 = vpop.permute.xlu1 %689 }
 0x60a   :  { %v695_v31 = vmul.f32 %v690_v25, %v2712_v14  ;;  %v1535_v25 = vadd.f32 -0.5, %v55_v24 }
 0x60c   :  { %v2766_v33 = vadd.f32 %v696_v26, %v695_v31  ;;  %v71_v26 = vmul.f32 0.5, %v1535_v25 }
 0x60d   :  { %v749_v59 = vpop.permute.xlu1 %748 }
 0x60e   :  { %2199 = vtanh.f32 %v2766_v33  ;;  %v754_v40 = vmul.f32 %v749_v59, %v2716_v18 }
 0x610   :  { %v2770_v42 = vadd.f32 %v755_v34, %v754_v40 }
 0x611   :  { %v694_v46 = vpop.permute.xlu1 %693 }
 0x612   :  { %2201 = vtanh.f32 %v2770_v42 }
 0x618   :  { %v2200_v44 = vpop.eup %2199 }
 0x619   :  { %v699_v48 = vmul.f32 %v2200_v44, %v694_v46 }
 0x61b   :  { %v760_v49 = vpack.c.bf16 %v699_v48, %v699_v48 }
 0x61c   :  { %v2202_v50 = vpop.eup %2201 }
 0x61d   :  { %793 = vmatprep.mubr.bf16.mxu1 %v760_v49  ;;  %v758_v14 = vmul.f32 %v2202_v50, %v753_v51 }
 0x61f   :  { %v759_v53 = vpack.c.bf16 %v758_v14, %v758_v14 }
 0x621   :  { %794 = vmatmul.mubr.bf16.vlgmr.msra.gmra.mrb[12].mxu1 %v759_v53  ;;  %1962 = vmatmul.mubr.bf16.vlgmr.msra.gmra.mrb[16].mxu0 %v759_v53 }
 0x622   :  { %1725 = vmatpush3.bf16.msra.mxu1 %v2508_v22  ;;  %1966 = vmatpush3.bf16.msra.mxu0 %v2414_v2  ;;  %v98_v2 = vpop.permute.xlu1 %97 }
 0x623   :  { %1726 = vmatprep.subr.bf16.mxu1 %v2513_v23  ;;  %1967 = vmatprep.subr.bf16.mxu0 %v2333_v0 }
 0x624   :  { %1981 = vmatprep.mubr.msk.bf16.mxu0 %vm2334_vm0, %v2333_v0 }
 0x626   :  { %1727 = vmatpush3.bf16.msra.mxu1 %v2520_v27  ;;  %1968 = vmatpush3.bf16.msra.mxu0 %v2420_v3  ;;  %v125_v3 = vmul.f32 %v2491_v13, %v98_v2 }
 0x627   :  { %1728 = vmatprep.subr.bf16.mxu1 %v2526_v28  ;;  %1969 = vmatprep.subr.bf16.mxu0 %v2333_v0 }
 0x62a   :  { %1729 = vmatpush3.bf16.msra.mxu1 %v2532_v29  ;;  %1970 = vmatpush3.bf16.msra.mxu0 %v2427_v4  ;;  %v140_v4 = vadd.f32 %v2497_v16, %v125_v3 }
 0x62b   :  { %1730 = vmatprep.subr.bf16.mxu1 %v2538_v30  ;;  %1971 = vmatprep.subr.bf16.mxu0 %v2333_v0 }
 0x62e   :  { %1731 = vmatpush3.bf16.msra.mxu1 %v2546_v32  ;;  %1972 = vmatpush3.bf16.msra.mxu0 %v2436_v6 }
 0x62f   :  { %1732 = vmatprep.subr.bf16.mxu1 %v2552_v35  ;;  %1973 = vmatprep.subr.bf16.mxu0 %v2333_v0 }
 0x632   :  { %1733 = vmatpush3.bf16.msra.mxu1 %v2557_v36  ;;  %1974 = vmatpush3.bf16.msra.mxu0 %v2443_v9 }
 0x633   :  { %1734 = vmatprep.subr.bf16.mxu1 %v2564_v37  ;;  %1975 = vmatprep.subr.bf16.mxu0 %v2333_v0 }
 0x636   :  { %1735 = vmatpush3.bf16.msra.mxu1 %v2569_v38  ;;  %1976 = vmatpush3.bf16.msra.mxu0 %v2450_v10 }
 0x637   :  { %1736 = vmatprep.subr.bf16.mxu1 %v2574_v39  ;;  %1977 = vmatprep.subr.bf16.mxu0 %v2333_v0 }
 0x63a   :  { %1737 = vmatpush3.bf16.msra.mxu1 %v2584_v41  ;;  %1978 = vmatpush3.bf16.msra.mxu0 %v2457_v11 }
 0x63b   :  { %1738 = vmatprep.subr.bf16.mxu1 %v2590_v43  ;;  %1979 = vmatprep.subr.bf16.mxu0 %v2333_v0 }
 0x63e   :  { %1739 = vmatpush3.bf16.msra.mxu1 %v2596_v45  ;;  %1980 = vmatpush3.bf16.msra.mxu0 %v2465_v12 }
 0x63f   :  { %1755 = vmatprep.subr.bf16.mxu1 %v2503_v21  ;;  %1985 = vmatprep.subr.bf16.mxu0 %v2333_v0 }
 0x6f4   :  { %v1709_v6 = vpop.f32.mrb[12].mxu1  ;;  %v853_v9 = vpop.f32.mrb[16].mxu0 }
 0x6f5   :  { %v859_v10 = vadd.f32 %v853_v9, %v140_v4  ;;  %v1710_v11 = vpop.f32.mrb[13].mxu1  ;;  %v1963_v18 = vpop.f32.mrb[17].mxu0 }
 0x6f6   :  { %v1711_v54 = vadd.f32 %v1710_v11, %v1709_v6  ;;  %v1712_v56 = vpop.f32.mrb[14].mxu1  ;;  %v856_v57 = vpop.f32.mrb[18].mxu0 }
 0x6f7   :  { %v1573_v58 = vmul.f32 -1.442695, %v859_v10  ;;  %v1713_v60 = vpop.f32.mrb[15].mxu1  ;;  %v1964_v61 = vpop.f32.mrb[19].mxu0 }
 0x6f8   :  { %v796_v62 = vadd.f32 %v1711_v54, %v2646_v63 }
 0x6f9   :  { %2203 = vpow2.f32 %v1573_v58 }
 0x6fa   :  { %v1572_v1 = vmul.f32 -1.442695, %v796_v62  ;;  %2205 = vtanh.f32 %v796_v62 }
 0x6fc   :  { %2207 = vpow2.f32 %v1572_v1  ;;  %v56_v1 = vld [vmem:[%s3170_s0 + $0x30] sm:$0xff] }
 0x6fd   :  { %2209 = vtanh.f32 %v859_v10 }
 0x703   :  { %v2204_v5 = vpop.eup %2203 }
 0x704   :  { %v2206_v7 = vpop.eup %2205  ;;  %v863_v8 = vadd.f32 1.0, %v2204_v5  ;;  %v1536_v5 = vadd.f32 -0.5, %v56_v1 }
 0x705   :  { %810 = vrot.lane.b32.xlu1 %v2206_v7, %s2331_s23 }
 0x706   :  { %v2208_v52 = vpop.eup %2207  ;;  %2211 = vrcp.f32 %v863_v8  ;;  %v72_v7 = vmul.f32 0.5, %v1536_v5 }
 0x707   :  { %v804_v15 = vadd.f32 1.0, %v2208_v52  ;;  %v2210_v17 = vpop.eup %2209 }
 0x709   :  { %2213 = vrcp.f32 %v804_v15  ;;  %869 = vrot.lane.b32.xlu1 %v2210_v17, %s2331_s23 }
 0x710   :  { %v2212_v19 = vpop.eup %2211 }
 0x711   :  { %871 = vrot.lane.b32.xlu1 %v2212_v19, %s2336_s22 }
 0x713   :  { %v2214_v20 = vpop.eup %2213 }
 0x714   :  { %808 = vrot.lane.b32.xlu0 %v2214_v20, %s2337_s24 }
 0x718   :  { %867 = vrot.lane.b32.xlu0 %v2212_v19, %s2337_s24 }
 0x71c   :  { %812 = vrot.lane.b32.xlu0 %v2214_v20, %s2336_s22 }
 0x720   :  { %102 = vperm.xlu0 %2113, %v71_v26  }
 0x777   :  { %v811_v31 = vpop.permute.xlu1 %810 }
 0x778   :  { %v815_v59 = vmul.f32 %v2214_v20, %v811_v31 }
 0x77b   :  { %v870_v40 = vpop.permute.xlu1 %869 }
 0x77c   :  { %v874_v48 = vmul.f32 %v2212_v19, %v870_v40 }
 0x783   :  { %v872_v4 = vpop.permute.xlu1 %871 }
 0x786   :  { %v809_v55 = vpop.permute.xlu0 %808 }
 0x787   :  { %v814_v34 = vmul.f32 %v809_v55, %v2766_v33 }
 0x789   :  { %v2820_v44 = vadd.f32 %v815_v59, %v814_v34 }
 0x78a   :  { %v868_v46 = vpop.permute.xlu0 %867 }
 0x78b   :  { %2215 = vtanh.f32 %v2820_v44  ;;  %v873_v49 = vmul.f32 %v868_v46, %v2770_v42  ;;  %v2831_v42 = vld [vmem:[%s3173_s3] sm:$0xff]  }
 0x78d   :  { %v2824_v50 = vadd.f32 %v874_v48, %v873_v49 }
 0x78e   :  { %v813_v14 = vpop.permute.xlu0 %812 }
 0x78f   :  { %2217 = vtanh.f32 %v2824_v50 }
 0x795   :  { %v2216_v51 = vpop.eup %2215 }
 0x796   :  { %v818_v53 = vmul.f32 %v2216_v51, %v813_v14  ;;  %v2919_v51 = vld [vmem:[%s3174_s4] sm:$0xff]   ;;  %v2935_v14 = vld [vmem:[%s3174_s4 + $0x8] sm:$0xff]  }
 0x798   :  { %v879_v2 = vpack.c.bf16 %v818_v53, %v818_v53  ;;  %v2942_v53 = vld [vmem:[%s3174_s4 + $0x50] sm:$0xff]  }
 0x799   :  { %v2218_v3 = vpop.eup %2217 }
 0x79a   :  { %912 = vmatprep.mubr.bf16.mxu1 %v879_v2  ;;  %v877_v33 = vmul.f32 %v2218_v3, %v872_v4  ;;  %v2949_v2 = vld [vmem:[%s3174_s4 + $0x10] sm:$0xff]   ;;  %v2956_v3 = vld [vmem:[%s3174_s4 + $0x58] sm:$0xff]  }
 0x79b   :  { %v2963_v4 = vld [vmem:[%s3174_s4 + $0x18] sm:$0xff]  }
 0x79c   :  { %v878_v6 = vpack.c.bf16 %v877_v33, %v877_v33  ;;  %v2970_v33 = vld [vmem:[%s3174_s4 + $0x60] sm:$0xff]  }
 0x79e   :  { %913 = vmatmul.mubr.bf16.vlgmr.msra.gmra.mrb[16].mxu1 %v878_v6  ;;  %1982 = vmatmul.mubr.bf16.vlgmr.msra.gmra.mrb[20].mxu0 %v878_v6  ;;  %v2977_v6 = vld [vmem:[%s3174_s4 + $0x20] sm:$0xff]  }
 0x79f   :  { %1756 = vmatpush3.bf16.msra.mxu1 %v2508_v22  ;;  %1986 = vmatpush3.bf16.msra.mxu0 %v2831_v42  ;;  %v2842_v22 = vld [vmem:[%s3173_s3 + $0x8] sm:$0xff]  }
 0x7a0   :  { %1757 = vmatprep.subr.bf16.mxu1 %v2513_v23  ;;  %1987 = vmatprep.subr.bf16.mxu0 %v2333_v0  ;;  %v2851_v23 = vld [vmem:[%s3173_s3 + $0x10] sm:$0xff]  }
 0x7a1   :  { %2001 = vmatprep.mubr.msk.bf16.mxu0 %vm2334_vm0, %v2333_v0 }
 0x7a3   :  { %1758 = vmatpush3.bf16.msra.mxu1 %v2520_v27  ;;  %1988 = vmatpush3.bf16.msra.mxu0 %v2842_v22  ;;  %v2860_v27 = vld [vmem:[%s3173_s3 + $0x18] sm:$0xff]  }
 0x7a4   :  { %1759 = vmatprep.subr.bf16.mxu1 %v2526_v28  ;;  %1989 = vmatprep.subr.bf16.mxu0 %v2333_v0  ;;  %v2869_v28 = vld [vmem:[%s3173_s3 + $0x20] sm:$0xff]  }
 0x7a7   :  { %1760 = vmatpush3.bf16.msra.mxu1 %v2532_v29  ;;  %1990 = vmatpush3.bf16.msra.mxu0 %v2851_v23  ;;  %v2878_v29 = vld [vmem:[%s3173_s3 + $0x28] sm:$0xff]  }
 0x7a8   :  { %1761 = vmatprep.subr.bf16.mxu1 %v2538_v30  ;;  %1991 = vmatprep.subr.bf16.mxu0 %v2333_v0  ;;  %v2887_v30 = vld [vmem:[%s3173_s3 + $0x30] sm:$0xff]  }
 0x7ab   :  { %1762 = vmatpush3.bf16.msra.mxu1 %v2546_v32  ;;  %1992 = vmatpush3.bf16.msra.mxu0 %v2860_v27  ;;  %v103_v32 = vpop.permute.xlu0 %102 }
 0x7ac   :  { %1763 = vmatprep.subr.bf16.mxu1 %v2552_v35  ;;  %1993 = vmatprep.subr.bf16.mxu0 %v2333_v0  ;;  %v126_v35 = vmul.f32 %v2491_v13, %v103_v32  ;;  %v2302_v32 = vld [vmem:[%s3174_s4 + $0x40] sm:$0xff]  }
 0x7af   :  { %1764 = vmatpush3.bf16.msra.mxu1 %v2557_v36  ;;  %1994 = vmatpush3.bf16.msra.mxu0 %v2869_v28  ;;  %v141_v36 = vadd.f32 %v2497_v16, %v126_v35 }
 0x7b0   :  { %1765 = vmatprep.subr.bf16.mxu1 %v2564_v37  ;;  %1995 = vmatprep.subr.bf16.mxu0 %v2333_v0 }
 0x7b3   :  { %1766 = vmatpush3.bf16.msra.mxu1 %v2569_v38  ;;  %1996 = vmatpush3.bf16.msra.mxu0 %v2878_v29 }
 0x7b4   :  { %1767 = vmatprep.subr.bf16.mxu1 %v2574_v39  ;;  %1997 = vmatprep.subr.bf16.mxu0 %v2333_v0 }
 0x7b7   :  { %1768 = vmatpush3.bf16.msra.mxu1 %v2584_v41  ;;  %1998 = vmatpush3.bf16.msra.mxu0 %v2887_v30 }
 0x7b8   :  { %1769 = vmatprep.subr.bf16.mxu1 %v2590_v43  ;;  %1999 = vmatprep.subr.bf16.mxu0 %v2333_v0 }
 0x7bb   :  { %1770 = vmatpush3.bf16.msra.mxu1 %v2596_v45  ;;  %2000 = vmatpush3.bf16.msra.mxu0 %v2465_v12 }
 0x7bc   :  { %1786 = vmatprep.subr.bf16.mxu1 %v2503_v21  ;;  %2005 = vmatprep.subr.bf16.mxu0 %v2333_v0 }
 0x871   :  { %v1740_v37 = vpop.f32.mrb[16].mxu1  ;;  %v972_v38 = vpop.f32.mrb[20].mxu0 }
 0x872   :  { %v978_v39 = vadd.f32 %v972_v38, %v141_v36  ;;  %v1741_v41 = vpop.f32.mrb[17].mxu1  ;;  %v1983_v43 = vpop.f32.mrb[21].mxu0  ;;  %v3032_v36 = vld [vmem:[%s3171_s1] ss:$0 sm:$0xff] }
 0x873   :  { %v1742_v9 = vadd.f32 %v1741_v41, %v1740_v37  ;;  %v1743_v10 = vpop.f32.mrb[18].mxu1  ;;  %v975_v11 = vpop.f32.mrb[22].mxu0  ;;  %v3038_v38 = vld [vmem:[%s3172_s2] ss:$0 sm:$0xff] }
 0x874   :  { %v1575_v45 = vmul.f32 -1.442695, %v978_v39  ;;  %v1744_v18 = vpop.f32.mrb[19].mxu1  ;;  %v1984_v12 = vpop.f32.mrb[23].mxu0 }
 0x875   :  { %v915_v21 = vadd.f32 %v1742_v9, %v2646_v63 }
 0x876   :  { %2219 = vpow2.f32 %v1575_v45 }
 0x877   :  { %v1574_v54 = vmul.f32 -1.442695, %v915_v21  ;;  %2221 = vtanh.f32 %v915_v21 }
 0x879   :  { %2223 = vpow2.f32 %v1574_v54 }
 0x87a   :  { %2225 = vtanh.f32 %v978_v39 }
 0x880   :  { %v2220_v13 = vpop.eup %2219 }
 0x881   :  { %v2222_v16 = vpop.eup %2221  ;;  %v982_v56 = vadd.f32 1.0, %v2220_v13 }
 0x882   :  { %929 = vrot.lane.b32.xlu0 %v2222_v16, %s2331_s23 }
 0x883   :  { %v2224_v57 = vpop.eup %2223  ;;  %2227 = vrcp.f32 %v982_v56 }
 0x884   :  { %v923_v58 = vadd.f32 1.0, %v2224_v57  ;;  %v2226_v60 = vpop.eup %2225 }
 0x886   :  { %2229 = vrcp.f32 %v923_v58  ;;  %988 = vrot.lane.b32.xlu0 %v2226_v60, %s2331_s23 }
 0x88d   :  { %v2228_v61 = vpop.eup %2227 }
 0x88e   :  { %990 = vrot.lane.b32.xlu0 %v2228_v61, %s2336_s22 }
 0x890   :  { %v2230_v62 = vpop.eup %2229 }
 0x891   :  { %927 = vrot.lane.b32.xlu1 %v2230_v62, %s2337_s24 }
 0x895   :  { %986 = vrot.lane.b32.xlu1 %v2228_v61, %s2337_s24 }
 0x899   :  { %931 = vrot.lane.b32.xlu1 %v2230_v62, %s2336_s22 }
 0x89d   :  { %107 = vperm.xlu1 %2114, %v72_v7   ;;  %v57_v7 = vld [vmem:[%s3170_s0 + $0x38] sm:$0xff] }
 0x8f4   :  { %v930_v8 = vpop.permute.xlu0 %929 }
 0x8f5   :  { %v934_v15 = vmul.f32 %v2230_v62, %v930_v8  ;;  %v1537_v8 = vadd.f32 -0.5, %v57_v7 }
 0x8f8   :  { %v989_v19 = vpop.permute.xlu0 %988 }
 0x8f9   :  { %v993_v25 = vmul.f32 %v2228_v61, %v989_v19 }
 0x900   :  { %v991_v48 = vpop.permute.xlu0 %990 }
 0x903   :  { %v928_v52 = vpop.permute.xlu1 %927 }
 0x904   :  { %v933_v17 = vmul.f32 %v928_v52, %v2820_v44  ;;  %v73_v52 = vmul.f32 0.5, %v1537_v8 }
 0x906   :  { %v2909_v20 = vadd.f32 %v934_v15, %v933_v17 }
 0x907   :  { %v987_v24 = vpop.permute.xlu1 %986 }
 0x908   :  { %2231 = vtanh.f32 %v2909_v20  ;;  %v992_v26 = vmul.f32 %v987_v24, %v2824_v50  ;;  %v2926_v50 = vld [vmem:[%s3174_s4 + $0x48] sm:$0xff]  }
 0x90a   :  { %v2913_v31 = vadd.f32 %v993_v25, %v992_v26 }
 0x90b   :  { %v932_v59 = vpop.permute.xlu1 %931 }
 0x90c   :  { %2233 = vtanh.f32 %v2913_v31 }
 0x912   :  { %v2232_v55 = vpop.eup %2231 }
 0x913   :  { %v937_v34 = vmul.f32 %v2232_v55, %v932_v59 }
 0x915   :  { %v998_v40 = vpack.c.bf16 %v937_v34, %v937_v34 }
 0x916   :  { %v2234_v46 = vpop.eup %2233 }
 0x917   :  { %1031 = vmatprep.mubr.bf16.mxu1 %v998_v40  ;;  %v996_v44 = vmul.f32 %v2234_v46, %v991_v48 }
 0x919   :  { %v997_v49 = vpack.c.bf16 %v996_v44, %v996_v44 }
 0x91b   :  { %1032 = vmatmul.mubr.bf16.vlgmr.msra.gmra.mrb[20].mxu1 %v997_v49  ;;  %2002 = vmatmul.mubr.bf16.vlgmr.msra.gmra.mrb[24].mxu0 %v997_v49 }
 0x91c   :  { %1787 = vmatpush3.bf16.msra.mxu1 %v2919_v51  ;;  %2006 = vmatpush3.bf16.msra.mxu0 %v2831_v42  ;;  %v2984_v42 = vld [vmem:[%s3174_s4 + $0x68] sm:$0xff]   ;;  %v108_v35 = vpop.permute.xlu1 %107 }
 0x91d   :  { %1788 = vmatprep.subr.bf16.mxu1 %v2926_v50  ;;  %2007 = vmatprep.subr.bf16.mxu0 %v2333_v0  ;;  %v127_v37 = vmul.f32 %v3032_v36, %v108_v35 }
 0x91e   :  { %2021 = vmatprep.mubr.msk.bf16.mxu0 %vm2334_vm0, %v2333_v0 }
 0x91f   :  { %v142_v39 = vadd.f32 %v3038_v38, %v127_v37 }
 0x920   :  { %1789 = vmatpush3.bf16.msra.mxu1 %v2935_v14  ;;  %2008 = vmatpush3.bf16.msra.mxu0 %v2842_v22  ;;  %v2991_v22 = vld [vmem:[%s3174_s4 + $0x28] sm:$0xff]  }
 0x921   :  { %1790 = vmatprep.subr.bf16.mxu1 %v2942_v53  ;;  %2009 = vmatprep.subr.bf16.mxu0 %v2333_v0 }
 0x924   :  { %1791 = vmatpush3.bf16.msra.mxu1 %v2949_v2  ;;  %2010 = vmatpush3.bf16.msra.mxu0 %v2851_v23  ;;  %v2998_v23 = vld [vmem:[%s3174_s4 + $0x70] sm:$0xff]  }
 0x925   :  { %1792 = vmatprep.subr.bf16.mxu1 %v2956_v3  ;;  %2011 = vmatprep.subr.bf16.mxu0 %v2333_v0 }
 0x928   :  { %1793 = vmatpush3.bf16.msra.mxu1 %v2963_v4  ;;  %2012 = vmatpush3.bf16.msra.mxu0 %v2860_v27  ;;  %v3005_v27 = vld [vmem:[%s3174_s4 + $0x30] sm:$0xff]  }
 0x929   :  { %1794 = vmatprep.subr.bf16.mxu1 %v2970_v33  ;;  %2013 = vmatprep.subr.bf16.mxu0 %v2333_v0 }
 0x92c   :  { %1795 = vmatpush3.bf16.msra.mxu1 %v2977_v6  ;;  %2014 = vmatpush3.bf16.msra.mxu0 %v2869_v28  ;;  %v3012_v28 = vld [vmem:[%s3174_s4 + $0x78] sm:$0xff]  }
 0x92d   :  { %1796 = vmatprep.subr.bf16.mxu1 %v2984_v42  ;;  %2015 = vmatprep.subr.bf16.mxu0 %v2333_v0 }
 0x930   :  { %1797 = vmatpush3.bf16.msra.mxu1 %v2991_v22  ;;  %2016 = vmatpush3.bf16.msra.mxu0 %v2878_v29  ;;  %v3019_v29 = vld [vmem:[%s3174_s4 + $0x38] sm:$0xff]  }
 0x931   :  { %1798 = vmatprep.subr.bf16.mxu1 %v2998_v23  ;;  %2017 = vmatprep.subr.bf16.mxu0 %v2333_v0 }
 0x934   :  { %1799 = vmatpush3.bf16.msra.mxu1 %v3005_v27  ;;  %2018 = vmatpush3.bf16.msra.mxu0 %v2887_v30  ;;  %v2301_v30 = vld [vmem:[%s3173_s3 + $0x38] sm:$0xff]  }
 0x935   :  { %1800 = vmatprep.subr.bf16.mxu1 %v3012_v28  ;;  %2019 = vmatprep.subr.bf16.mxu0 %v2333_v0 }
 0x938   :  { %1801 = vmatpush3.bf16.msra.mxu1 %v3019_v29  ;;  %2020 = vmatpush3.bf16.msra.mxu0 %v2301_v30 }
 0x939   :  { %1817 = vmatprep.subr.bf16.mxu1 %v2302_v32  ;;  %2025 = vmatprep.subr.bf16.mxu0 %v2333_v0 }
 0x9ee   :  { %v1771_v41 = vpop.f32.mrb[20].mxu1  ;;  %v1091_v43 = vpop.f32.mrb[24].mxu0 }
 0x9ef   :  { %v1097_v9 = vadd.f32 %v1091_v43, %v142_v39  ;;  %v1772_v10 = vpop.f32.mrb[21].mxu1  ;;  %v2003_v11 = vpop.f32.mrb[25].mxu0 }
 0x9f0   :  { %v1773_v45 = vadd.f32 %v1772_v10, %v1771_v41  ;;  %v1774_v18 = vpop.f32.mrb[22].mxu1  ;;  %v1094_v12 = vpop.f32.mrb[26].mxu0 }
 0x9f1   :  { %v1577_v21 = vmul.f32 -1.442695, %v1097_v9  ;;  %v1775_v54 = vpop.f32.mrb[23].mxu1  ;;  %v2004_v13 = vpop.f32.mrb[27].mxu0 }
 0x9f2   :  { %v1034_v16 = vadd.f32 %v1773_v45, %v2646_v63 }
 0x9f3   :  { %2235 = vpow2.f32 %v1577_v21 }
 0x9f4   :  { %v1576_v56 = vmul.f32 -1.442695, %v1034_v16  ;;  %2237 = vtanh.f32 %v1034_v16 }
 0x9f6   :  { %2239 = vpow2.f32 %v1576_v56 }
 0x9f7   :  { %2241 = vtanh.f32 %v1097_v9 }
 0x9fd   :  { %v2236_v57 = vpop.eup %2235 }
 0x9fe   :  { %v2238_v58 = vpop.eup %2237  ;;  %v1101_v60 = vadd.f32 1.0, %v2236_v57 }
 0x9ff   :  { %1048 = vrot.lane.b32.xlu1 %v2238_v58, %s2331_s23 }
 0xa00   :  { %v2240_v61 = vpop.eup %2239  ;;  %2243 = vrcp.f32 %v1101_v60 }
 0xa01   :  { %v1042_v62 = vadd.f32 1.0, %v2240_v61  ;;  %v2242_v1 = vpop.eup %2241 }
 0xa03   :  { %2245 = vrcp.f32 %v1042_v62  ;;  %1107 = vrot.lane.b32.xlu1 %v2242_v1, %s2331_s23 }
 0xa0a   :  { %v2244_v5 = vpop.eup %2243 }
 0xa0b   :  { %1109 = vrot.lane.b32.xlu1 %v2244_v5, %s2336_s22 }
 0xa0d   :  { %v2246_v63 = vpop.eup %2245 }
 0xa0e   :  { %1046 = vrot.lane.b32.xlu0 %v2246_v63, %s2337_s24 }
 0xa12   :  { %1105 = vrot.lane.b32.xlu0 %v2244_v5, %s2337_s24 }
 0xa16   :  { %1050 = vrot.lane.b32.xlu0 %v2246_v63, %s2336_s22 }
 0xa1a   :  { %112 = vperm.xlu0 %2113, %v73_v52  }
 0xa71   :  { %v1049_v15 = vpop.permute.xlu1 %1048 }
 0xa72   :  { %v1053_v19 = vmul.f32 %v2246_v63, %v1049_v15 }
 0xa75   :  { %v1108_v25 = vpop.permute.xlu1 %1107 }
 0xa76   :  { %v1112_v59 = vmul.f32 %v2244_v5, %v1108_v25 }
 0xa7d   :  { %v1110_v32 = vpop.permute.xlu1 %1109 }
 0xa80   :  { %v1047_v17 = vpop.permute.xlu0 %1046 }
 0xa81   :  { %v1052_v24 = vmul.f32 %v1047_v17, %v2909_v20 }
 0xa83   :  { %v3052_v26 = vadd.f32 %v1053_v19, %v1052_v24 }
 0xa84   :  { %v1106_v55 = vpop.permute.xlu0 %1105 }
 0xa85   :  { %2247 = vtanh.f32 %v3052_v26  ;;  %v1111_v34 = vmul.f32 %v1106_v55, %v2913_v31 }
 0xa87   :  { %v3056_v40 = vadd.f32 %v1112_v59, %v1111_v34  ;;  %v2140_v59 = vld [vmem:[#allocation2 + $0x8] sm:$0xff]   ;;  %v2141_v34 = vld [vmem:[#allocation2 + $0x10] sm:$0xff]  }
 0xa88   :  { %v1051_v48 = vpop.permute.xlu0 %1050 }
 0xa89   :  { %2249 = vtanh.f32 %v3056_v40 }
 0xa8f   :  { %v2248_v46 = vpop.eup %2247 }
 0xa90   :  { %v1056_v44 = vmul.f32 %v2248_v46, %v1051_v48  ;;  %v2142_v46 = vld [vmem:[#allocation2 + $0x18] sm:$0xff]  }
 0xa92   :  { %v1117_v49 = vpack.c.bf16 %v1056_v44, %v1056_v44 }
 0xa93   :  { %v2250_v30 = vpop.eup %2249 }
 0xa94   :  { %1150 = vmatprep.mubr.bf16.mxu1 %v1117_v49  ;;  %v1115_v20 = vmul.f32 %v2250_v30, %v1110_v32  ;;  %v2143_v49 = vld [vmem:[#allocation2 + $0x20] sm:$0xff]   ;;  %v2144_v30 = vld [vmem:[#allocation2 + $0x28] sm:$0xff]   ;;  %v2145_v32 = vld [vmem:[#allocation2 + $0x30] sm:$0xff]  }
 0xa96   :  { %v1116_v35 = vpack.c.bf16 %v1115_v20, %v1115_v20 }
 0xa98   :  { %1151 = vmatmul.mubr.bf16.vlgmr.msra.gmra.mrb[24].mxu1 %v1116_v35  ;;  %2022 = vmatmul.mubr.bf16.vlgmr.msra.gmra.mrb[28].mxu0 %v1116_v35  ;;  %v2146_v35 = vld [vmem:[#allocation2 + $0x38] sm:$0xff]  }
 0xa99   :  { %1818 = vmatpush3.bf16.msra.mxu1 %v2919_v51  ;;  %2041 = vmatprep.mubr.msk.bf16.mxu0 %vm2334_vm0, %v2333_v0  ;;  %v113_v31 = vpop.permute.xlu0 %112 }
 0xa9a   :  { %1819 = vmatprep.subr.bf16.mxu1 %v2926_v50  ;;  %v128_v51 = vmul.f32 %v3032_v36, %v113_v31  ;;  %v1408_v31 = vld [vmem:[%s3178_s8] sm:$0xff] }
 0xa9c   :  { %v143_v50 = vadd.f32 %v3038_v38, %v128_v51  ;;  %v1409_v51 = vld [vmem:[%s3178_s8 + $0x8] sm:$0xff] }
 0xa9d   :  { %1820 = vmatpush3.bf16.msra.mxu1 %v2935_v14 }
 0xa9e   :  { %1821 = vmatprep.subr.bf16.mxu1 %v2942_v53 }
 0xaa1   :  { %1822 = vmatpush3.bf16.msra.mxu1 %v2949_v2 }
 0xaa2   :  { %1823 = vmatprep.subr.bf16.mxu1 %v2956_v3 }
 0xaa5   :  { %1824 = vmatpush3.bf16.msra.mxu1 %v2963_v4 }
 0xaa6   :  { %1825 = vmatprep.subr.bf16.mxu1 %v2970_v33 }
 0xaa9   :  { %1826 = vmatpush3.bf16.msra.mxu1 %v2977_v6 }
 0xaaa   :  { %1827 = vmatprep.subr.bf16.mxu1 %v2984_v42 }
 0xaad   :  { %1828 = vmatpush3.bf16.msra.mxu1 %v2991_v22 }
 0xaae   :  { %1829 = vmatprep.subr.bf16.mxu1 %v2998_v23 }
 0xab1   :  { %1830 = vmatpush3.bf16.msra.mxu1 %v3005_v27 }
 0xab2   :  { %1831 = vmatprep.subr.bf16.mxu1 %v3012_v28  ;;  %v2305_v28 = vld [vmem:[%s3175_s5] ss:$0 sm:$0xff] }
 0xab5   :  { %1832 = vmatpush3.bf16.msra.mxu1 %v3019_v29 }
 0xab6   :  { %2080 = vmatprep.subr.bf16.mxu1 %v2338_v47 }
 0xb6b   :  { %v1802_v14 = vpop.f32.mrb[24].mxu1  ;;  %v1210_v53 = vpop.f32.mrb[28].mxu0 }
 0xb6c   :  { %v1216_v2 = vadd.f32 %v1210_v53, %v143_v50  ;;  %v1803_v3 = vpop.f32.mrb[25].mxu1  ;;  %v2023_v4 = vpop.f32.mrb[29].mxu0  ;;  %v1410_v50 = vld [vmem:[%s3178_s8 + $0x10] sm:$0xff] }
 0xb6d   :  { %v1804_v33 = vadd.f32 %v1803_v3, %v1802_v14  ;;  %v1805_v6 = vpop.f32.mrb[26].mxu1  ;;  %v1213_v42 = vpop.f32.mrb[30].mxu0  ;;  %v2081_v14 = vpack.c.bf16 %v1409_v51, %v1408_v31  ;;  %v1413_v3 = vld [vmem:[%s3178_s8 + $0x28] sm:$0xff] }
 0xb6e   :  { %v1579_v22 = vmul.f32 -1.442695, %v1216_v2  ;;  %v1806_v23 = vpop.f32.mrb[27].mxu1  ;;  %v2024_v27 = vpop.f32.mrb[31].mxu0  ;;  %v1415_v6 = vld [vmem:[%s3178_s8 + $0x38] sm:$0xff] }
 0xb6f   :  { %v1153_v29 = vadd.f32 %v2305_v28, %v1804_v33  ;;  %v1414_v33 = vld [vmem:[%s3178_s8 + $0x30] sm:$0xff]  ;;  %v1417_v23 = vld [vmem:[%s3178_s8 + $0x48] sm:$0xff] }
 0xb70   :  { %2251 = vpow2.f32 %v1579_v22  ;;  %v2090_v42 = vpack.c.bf16 %v1415_v6, %v1414_v33  ;;  %v1416_v22 = vld [vmem:[%s3178_s8 + $0x40] sm:$0xff] }
 0xb71   :  { %v1578_v36 = vmul.f32 -1.442695, %v1153_v29  ;;  %2253 = vtanh.f32 %v1153_v29  ;;  %v2093_v27 = vpack.c.bf16 %v1417_v23, %v1416_v22  ;;  %v1419_v29 = vld [vmem:[%s3178_s8 + $0x58] sm:$0xff] }
 0xb73   :  { %2255 = vpow2.f32 %v1578_v36 }
 0xb74   :  { %2257 = vtanh.f32 %v1216_v2  ;;  %v1412_v2 = vld [vmem:[%s3178_s8 + $0x20] sm:$0xff] }
 0xb75   :  { %v2087_v4 = vpack.c.bf16 %v1413_v3, %v1412_v2 }
 0xb7a   :  { %v2252_v37 = vpop.eup %2251 }
 0xb7b   :  { %v2254_v38 = vpop.eup %2253  ;;  %v1220_v39 = vadd.f32 1.0, %v2252_v37  ;;  %v1420_v37 = vld [vmem:[%s3178_s8 + $0x60] sm:$0xff] }
 0xb7c   :  { %1167 = vrot.lane.b32.xlu0 %v2254_v38, %s2331_s23  ;;  %v1421_v38 = vld [vmem:[%s3178_s8 + $0x68] sm:$0xff] }
 0xb7d   :  { %v2256_v41 = vpop.eup %2255  ;;  %2259 = vrcp.f32 %v1220_v39  ;;  %v2099_v39 = vpack.c.bf16 %v1421_v38, %v1420_v37 }
 0xb7e   :  { %v1161_v43 = vadd.f32 1.0, %v2256_v41  ;;  %v2258_v9 = vpop.eup %2257 }
 0xb80   :  { %2261 = vrcp.f32 %v1161_v43  ;;  %1226 = vrot.lane.b32.xlu0 %v2258_v9, %s2331_s23 }
 0xb87   :  { %v2260_v10 = vpop.eup %2259 }
 0xb88   :  { %1228 = vrot.lane.b32.xlu0 %v2260_v10, %s2336_s22 }
 0xb8a   :  { %v2262_v11 = vpop.eup %2261 }
 0xb8b   :  { %1165 = vrot.lane.b32.xlu1 %v2262_v11, %s2337_s24 }
 0xb8f   :  { %1224 = vrot.lane.b32.xlu1 %v2260_v10, %s2337_s24 }
 0xb93   :  { %1169 = vrot.lane.b32.xlu1 %v2262_v11, %s2336_s22 }
 0xbee   :  { %v1168_v45 = vpop.permute.xlu0 %1167 }
 0xbef   :  { %v1172_v12 = vmul.f32 %v2262_v11, %v1168_v45 }
 0xbf2   :  { %v1227_v54 = vpop.permute.xlu0 %1226 }
 0xbf3   :  { %v1231_v56 = vmul.f32 %v2260_v10, %v1227_v54  ;;  %v1422_v54 = vld [vmem:[%s3178_s8 + $0x70] sm:$0xff] }
 0xbfa   :  { %v1229_v63 = vpop.permute.xlu0 %1228 }
 0xbfd   :  { %v1166_v18 = vpop.permute.xlu1 %1165 }
 0xbfe   :  { %v1171_v21 = vmul.f32 %v1166_v18, %v3052_v26  ;;  %v2139_v26 = vld [vmem:[#allocation2] sm:$0xff]  }
 0xbff   :  { %2026 = vmatpush3.bf16.msra.mxu0 %v2139_v26 }
 0xc00   :  { %v3089_v13 = vadd.f32 %v1172_v12, %v1171_v21  ;;  %2027 = vmatprep.subr.bf16.mxu0 %v2333_v0 }
 0xc01   :  { %v1225_v16 = vpop.permute.xlu1 %1224 }
 0xc02   :  { %2263 = vtanh.f32 %v3089_v13  ;;  %v1230_v57 = vmul.f32 %v1225_v16, %v3056_v40 }
 0xc03   :  { %2028 = vmatpush3.bf16.msra.mxu0 %v2140_v59 }
 0xc04   :  { %v1232_v58 = vadd.f32 %v1231_v56, %v1230_v57  ;;  %2029 = vmatprep.subr.bf16.mxu0 %v2333_v0 }
 0xc05   :  { %v1170_v61 = vpop.permute.xlu1 %1169 }
 0xc06   :  { %2265 = vtanh.f32 %v1232_v58 }
 0xc07   :  { %2030 = vmatpush3.bf16.msra.mxu0 %v2141_v34 }
 0xc08   :  { %2031 = vmatprep.subr.bf16.mxu0 %v2333_v0 }
 0xc0b   :  { %2032 = vmatpush3.bf16.msra.mxu0 %v2142_v46 }
 0xc0c   :  { %v2264_v60 = vpop.eup %2263  ;;  %2033 = vmatprep.subr.bf16.mxu0 %v2333_v0 }
 0xc0d   :  { %v1175_v62 = vmul.f32 %v2264_v60, %v1170_v61 }
 0xc0f   :  { %v1236_v1 = vpack.c.bf16 %v1175_v62, %v1175_v62  ;;  %2034 = vmatpush3.bf16.msra.mxu0 %v2143_v49 }
 0xc10   :  { %v2266_v5 = vpop.eup %2265  ;;  %2035 = vmatprep.subr.bf16.mxu0 %v2333_v0 }
 0xc11   :  { %1269 = vmatprep.mubr.bf16.mxu1 %v1236_v1  ;;  %v1234_v7 = vmul.f32 %v2266_v5, %v1229_v63  ;;  %v1590_v1 = vld [vmem:[%s3179_s9] ss:$0 sm:$0xff] }
 0xc13   :  { %v1235_v8 = vpack.c.bf16 %v1234_v7, %v1234_v7  ;;  %2036 = vmatpush3.bf16.msra.mxu0 %v2144_v30 }
 0xc14   :  { %2037 = vmatprep.subr.bf16.mxu0 %v2333_v0 }
 0xc15   :  { %1270 = vmatmul.mubr.bf16.vlgmr.msra.gmra.mrb[28].mxu1 %v1235_v8 }
 0xc16   :  { %2077 = vmatprep.mubr.msk.f32.mxu1 %vm2334_vm0, %v2333_v0  ;;  %2082 = vmatpush3.bf16.msra.mxu1 %v2081_v14 }
 0xc17   :  { %2038 = vmatpush3.bf16.msra.mxu0 %v2145_v32  ;;  %2083 = vmatprep.subr.bf16.mxu1 %v2338_v47 }
 0xc18   :  { %2039 = vmatprep.subr.bf16.mxu0 %v2333_v0  ;;  %v1411_v0 = vld [vmem:[%s3178_s8 + $0x18] sm:$0xff] }
 0xc19   :  { %v2084_v53 = vpack.c.bf16 %v1411_v0, %v1410_v50 }
 0xc1b   :  { %2040 = vmatpush3.bf16.msra.mxu0 %v2146_v35  ;;  %2085 = vmatpush3.bf16.msra.mxu1 %v2084_v53 }
 0xc1c   :  { %2086 = vmatprep.subr.bf16.mxu1 %v2338_v47 }
 0xc1f   :  { %2088 = vmatpush3.bf16.msra.mxu1 %v2087_v4 }
 0xc20   :  { %2089 = vmatprep.subr.bf16.mxu1 %v2338_v47 }
 0xc23   :  { %2091 = vmatpush3.bf16.msra.mxu1 %v2090_v42 }
 0xc24   :  { %2092 = vmatprep.subr.bf16.mxu1 %v2338_v47 }
 0xc27   :  { %2094 = vmatpush3.bf16.msra.mxu1 %v2093_v27 }
 0xc28   :  { %2095 = vmatprep.subr.bf16.mxu1 %v2338_v47 }
 0xce8   :  { %v1833_v52 = vpop.f32.mrb[28].mxu1 }
 0xce9   :  { %v1834_v15 = vpop.f32.mrb[29].mxu1 }
 0xcea   :  { %v1835_v17 = vadd.f32 %v1834_v15, %v1833_v52  ;;  %v1836_v19 = vpop.f32.mrb[30].mxu1 }
 0xceb   :  { %v1837_v24 = vpop.f32.mrb[31].mxu1 }
 0xcec   :  { %v1272_v25 = vadd.f32 %v2305_v28, %v1835_v17  ;;  %v1418_v28 = vld [vmem:[%s3178_s8 + $0x50] sm:$0xff] }
 0xced   :  { %v2096_v36 = vpack.c.bf16 %v1419_v29, %v1418_v28 }
 0xcee   :  { %v1580_v55 = vmul.f32 -1.442695, %v1272_v25  ;;  %2267 = vtanh.f32 %v1272_v25  ;;  %v1501_v25 = vlaneseq }
 0xcef   :  { %2097 = vmatpush3.bf16.msra.mxu1 %v2096_v36 }
 0xcf0   :  { %2269 = vpow2.f32 %v1580_v55  ;;  %2098 = vmatprep.subr.bf16.mxu1 %v2338_v47  ;;  %v1502_v34 = vand.u32 127, %v1501_v25 }
 0xcf2   :  { %vm1503_vm2 = vcmp.eq.s32.totalorder %v1502_v34, 0 }
 0xcf3   :  { %2100 = vmatpush3.bf16.msra.mxu1 %v2099_v39 }
 0xcf4   :  { %2101 = vmatprep.subr.bf16.mxu1 %v2338_v47  ;;  %v1423_v47 = vld [vmem:[%s3178_s8 + $0x78] sm:$0xff] }
 0xcf5   :  { %v2102_v16 = vpack.c.bf16 %v1423_v47, %v1422_v54 }
 0xcf7   :  { %2103 = vmatpush3.bf16.msra.mxu1 %v2102_v16 }
 0xcf8   :  { %v2268_v40 = vpop.eup %2267 }
 0xcf9   :  { %1286 = vrot.lane.b32.xlu0 %v2268_v40, %s2331_s23 }
 0xcfa   :  { %v2270_v48 = vpop.eup %2269 }
 0xcfb   :  { %v1280_v44 = vadd.f32 1.0, %v2270_v48 }
 0xcfd   :  { %2271 = vrcp.f32 %v1280_v44 }
 0xd07   :  { %v2272_v20 = vpop.eup %2271 }
 0xd08   :  { %1284 = vrot.lane.b32.xlu1 %v2272_v20, %s2337_s24 }
 0xd0c   :  { %1288 = vrot.lane.b32.xlu1 %v2272_v20, %s2336_s22 }
 0xd6b   :  { %v1287_v41 = vpop.permute.xlu0 %1286 }
 0xd6c   :  { %v1291_v9 = vmul.f32 %v2272_v20, %v1287_v41 }
 0xd7a   :  { %v1285_v43 = vpop.permute.xlu1 %1284 }
 0xd7b   :  { %v1290_v10 = vmul.f32 %v1285_v43, %v3089_v13  ;;  %v1581_v13 = vld [vmem:[%s3177_s7] ss:$0 sm:$0xff] }
 0xd7d   :  { %v1292_v11 = vadd.f32 %v1291_v9, %v1290_v10 }
 0xd7e   :  { %v1289_v18 = vpop.permute.xlu1 %1288 }
 0xd7f   :  { %2273 = vtanh.f32 %v1292_v11 }
 0xd89   :  { %v2274_v45 = vpop.eup %2273 }
 0xd8a   :  { %v1294_v12 = vmul.f32 %v2274_v45, %v1289_v18 }
 0xd8c   :  { %v1295_v21 = vpack.c.bf16 %v1294_v12, %v1294_v12 }
 0xd8e   :  { %2042 = vmatmul.mubr.bf16.vlgmr.msra.gmra.mrb[32].mxu0 %v1295_v21 }
 0xe61   :  { %v1401_v56 = vpop.f32.mrb[32].mxu0 }
 0xe62   :  { %v1402_v57 = vadd.f32 %v1581_v13, %v1401_v56  ;;  %v2043_v58 = vpop.f32.mrb[33].mxu0 }
 0xe63   :  { %v1404_v60 = vpop.f32.mrb[34].mxu0 }
 0xe64   :  { %v1407_v61 = vmax.f32 %v1402_v57, 0.0  ;;  %v2044_v62 = vpop.f32.mrb[35].mxu0 }
 0xe66   :  { %2078 = vmatmul.mubr.f32.vlgmr.msra.gmra.mrb[32].mxu1 %v1407_v61 }
 0xf39   :  { %v1497_v5 = vpop.f32.mrb[32].mxu1 }
 0xf3a   :  { %v1498_v63 = vadd.f32 %v1590_v1, %v1497_v5  ;;  %v2079_v7 = vpop.f32.mrb[33].mxu1 }
 0xf3c   :  { %v1507_v8 = vand.u32 2147483647, %v1498_v63  ;;  %v1504_v48 = vmax.f32 %v1498_v63, 0.0  ;;  %vm1505_vm3 = vcmp.ne.f32.partialorder %v1498_v63, %v1498_v63 }
 0xf3e   :  { %v1508_v52 = vsub.f32 0.0, %v1507_v8 }
 0xf40   :  { %v1509_v15 = vmul.f32 1.442695, %v1508_v52 }
 0xf42   :  { %2275 = vpow2.f32 %v1509_v15 }
 0xf4c   :  { %v2276_v17 = vpop.eup %2275 }
 0xf4d   :  { %v1511_v19 = vadd.f32 1.0, %v2276_v17  ;;  %v1514_v24 = vmul.f32 -0.5, %v2276_v17  ;;  %v1517_v55 = vand.u32 2147483647, %v2276_v17 }
 0xf4f   :  { %2277 = vlog2.f32 %v1511_v19  ;;  %v1515_v26 = vadd.f32 1.0, %v1514_v24  ;;  %vm1518_vm1 = vcmp.lt.f32.partialorder %v1517_v55, 0.0004427343 }
 0xf51   :  { %v1516_v46 = vmul.f32 %v2276_v17, %v1515_v26 }
 0xf59   :  { %v2278_v59 = vpop.eup %2277 }
 0xf5a   :  { %v1513_v40 = vmul.f32 0.6931472, %v2278_v59 }
 0xf5c   :  { %v1519_v44 = vsel %vm1518_vm1, %v1516_v46, %v1513_v40 }
 0xf5d   :  { %v1520_v49 = vadd.f32 %v1519_v44, %v1504_v48 }
 0xf5f   :  { %v1521_v30 = vsel %vm1505_vm3, %v1498_v63, %v1520_v49 }
 0xf60   :  { %v1522_v32 = vsel %vm1503_vm2, %v1498_v63, %v1521_v30 }
 0xf61   :  { %1524 = vst.msk [vmem:[%s3180_s10] sm:$0xff] %vm1523_vm4, %v1522_v32 }
 0xf62   :  { %1529 = vsyncpa [#allocation3], 1 }

</bundles_post_ra>
